<compile_context>
chip_gen: v6e
topology: v6e:2x2x1
jax: 0.10.0
libtpu: 0.0.40
codegen_flags: <defaults>
</compile_context>

<pallas_src>
import functools

import jax
import jax.numpy as jnp
from jax.experimental import pallas as pl
from jax.experimental.pallas import tpu as pltpu


def _round_up(x, m):
    return ((x + m - 1) // m) * m


# ----------------------------- Pallas kernels -------------------------------


def _matmul_bias_act_kernel(a_ref, w_ref, b_ref, o_ref, *, lrelu):
    # a_ref: (TM, K) bf16   w_ref: (K, N) bf16   b_ref: (1, N) f32   o_ref: (TM, N)
    acc = jnp.dot(a_ref[...], w_ref[...], preferred_element_type=jnp.float32)
    acc = acc + b_ref[...]
    if lrelu:
        acc = jnp.where(acc > 0, acc, 0.2 * acc)  # LeakyReLU(0.2), f32 on the VPU
    o_ref[...] = acc.astype(o_ref.dtype)


def _conv_matmul(a, w2d, bias, *, lrelu, out_dtype, tm_max=256):
    """(M, K) @ (K, N) + bias (+ LeakyReLU), tiled & software-pipelined over M."""
    M, K = a.shape
    N = w2d.shape[1]
    tm = min(tm_max, _round_up(M, 8))
    Mp = _round_up(M, tm)
    if Mp != M:
        a = jnp.pad(a, ((0, Mp - M), (0, 0)))
    out = pl.pallas_call(
        functools.partial(_matmul_bias_act_kernel, lrelu=lrelu),
        out_shape=jax.ShapeDtypeStruct((Mp, N), out_dtype),
        grid=(Mp // tm,),
        in_specs=[
            pl.BlockSpec((tm, K), lambda i: (i, 0)),   # patches: streamed over M
            pl.BlockSpec((K, N), lambda i: (0, 0)),    # weight: stays VMEM-resident
            pl.BlockSpec((1, N), lambda i: (0, 0)),    # bias: fetched once
        ],
        out_specs=pl.BlockSpec((tm, N), lambda i: (i, 0)),
        compiler_params=pltpu.CompilerParams(
            dimension_semantics=("parallel",),         # shard M tiles across TCs (v7x)
            vmem_limit_bytes=32 * 1024 * 1024,
        ),
    )(a, w2d, bias)
    return out[:M] if Mp != M else out


def _pool_linear_kernel(x_ref, w_ref, b_ref, o_ref, *, inv_p):
    # x_ref: (N, P, C) bf16   w_ref: (C, S) f32   b_ref: (1, S) f32   o_ref: (N, S) f32
    x = x_ref[...].astype(jnp.float32)
    pooled = jnp.sum(x, axis=1) * inv_p                # global average pool, f32
    acc = jnp.dot(pooled, w_ref[...], preferred_element_type=jnp.float32)
    o_ref[...] = acc + b_ref[...]


# ------------------------------ JAX glue -------------------------------------


def _im2col(x_nhwc, k, stride, pad):
    """Zero-pad + extract k x k patches. Returns ([N, OH, OW, k*k*C], OH, OW)."""
    x = jnp.pad(x_nhwc, ((0, 0), (pad, pad), (pad, pad), (0, 0)))
    N, H, W, C = x.shape
    OH = (H - k) // stride + 1
    OW = (W - k) // stride + 1
    cols = []
    for i in range(k):
        for j in range(k):
            cols.append(x[:, i:i + stride * OH:stride, j:j + stride * OW:stride, :])
    patches = jnp.stack(cols, axis=-2)                 # [N, OH, OW, k*k, C]
    return patches.reshape(N, OH, OW, k * k * C), OH, OW


def _conv_layer(x_nhwc, w_oihw, bias, *, stride, pad, lrelu):
    """Conv2dLayer (norm='none'): zero-pad -> conv -> LeakyReLU(0.2)."""
    Cout, Cin, KH, KW = w_oihw.shape
    patches, OH, OW = _im2col(x_nhwc.astype(jnp.bfloat16), KH, stride, pad)
    Nb = x_nhwc.shape[0]
    K = KH * KW * Cin
    a = patches.reshape(Nb * OH * OW, K)
    # weight [Cout, Cin, KH, KW] -> [KH, KW, Cin, Cout] -> [K, Cout] (matches patch order)
    w2d = jnp.transpose(w_oihw, (2, 3, 1, 0)).reshape(K, Cout).astype(jnp.bfloat16)
    b2d = bias.reshape(1, Cout).astype(jnp.float32)
    # pad K to a bf16-friendly multiple of 16 (zero rows/cols contribute nothing)
    Kp = _round_up(K, 16)
    if Kp != K:
        a = jnp.pad(a, ((0, 0), (0, Kp - K)))
        w2d = jnp.pad(w2d, ((0, Kp - K), (0, 0)))
    out = _conv_matmul(a, w2d, b2d, lrelu=lrelu, out_dtype=jnp.bfloat16)
    return out.reshape(Nb, OH, OW, Cout)


def _global_pool_linear(x_nhwc, w_oihw, bias):
    """AdaptiveAvgPool2d(1) + 1x1 conv fused into one kernel. Returns (N, style_dim)."""
    Nb, H, W, C = x_nhwc.shape
    S = w_oihw.shape[0]
    P = H * W
    x = x_nhwc.reshape(Nb, P, C).astype(jnp.bfloat16)
    Spad = _round_up(S, 128)                           # lane-dense output, sliced below
    w2 = jnp.transpose(w_oihw.reshape(S, C), (1, 0)).astype(jnp.float32)  # (C, S)
    w2 = jnp.pad(w2, ((0, 0), (0, Spad - S)))
    b2 = jnp.pad(bias.astype(jnp.float32), (0, Spad - S)).reshape(1, Spad)
    out = pl.pallas_call(
        functools.partial(_pool_linear_kernel, inv_p=1.0 / P),
        out_shape=jax.ShapeDtypeStruct((Nb, Spad), jnp.float32),
        grid=(1,),
        in_specs=[
            pl.BlockSpec((Nb, P, C), lambda i: (0, 0, 0)),
            pl.BlockSpec((C, Spad), lambda i: (0, 0)),
            pl.BlockSpec((1, Spad), lambda i: (0, 0)),
        ],
        out_specs=pl.BlockSpec((Nb, Spad), lambda i: (0, 0)),
        compiler_params=pltpu.CompilerParams(dimension_semantics=("arbitrary",)),
    )(x, w2, b2)
    return out[:, :S]


def init_params(key, *, in_dim=3, dim=16, n_downsample=3, style_dim=8):
    """Deterministic synthetic parameters matching StyleEncoder's layer shapes."""
    specs = [(dim, in_dim, 7)]                         # 7x7, s1, p3
    d = dim
    for _ in range(2):                                 # 2x downsample, dim doubles
        specs.append((d * 2, d, 4))
        d *= 2
    for _ in range(n_downsample - 2):                  # extra downsamples, dim fixed
        specs.append((d, d, 4))
    keys = jax.random.split(key, len(specs) + 1)
    convs = []
    for kk, (cout, cin, ksz) in zip(keys[:-1], specs):
        kw, kb = jax.random.split(kk)
        w = jax.random.normal(kw, (cout, cin, ksz, ksz), jnp.float32) * 0.05
        b = jax.random.normal(kb, (cout,), jnp.float32) * 0.01
        convs.append((w, b))
    kw, kb = jax.random.split(keys[-1])
    fw = jax.random.normal(kw, (style_dim, d, 1, 1), jnp.float32) * 0.05
    fb = jax.random.normal(kb, (style_dim,), jnp.float32) * 0.01
    return {"convs": convs, "final": (fw, fb)}


@jax.jit
def style_encoder(x_nchw, params):
    """StyleEncoder.forward: NCHW input -> (N, style_dim)."""
    x = jnp.transpose(x_nchw, (0, 2, 3, 1)).astype(jnp.float32)    # -> NHWC
    convs = params["convs"]
    w, b = convs[0]
    x = _conv_layer(x, w, b, stride=1, pad=3, lrelu=True)          # 7x7, s1, p3
    for w, b in convs[1:]:
        x = _conv_layer(x, w, b, stride=2, pad=1, lrelu=True)      # 4x4, s2, p1
    fw, fb = params["final"]
    return _global_pool_linear(x, fw, fb)                          # pool + 1x1 conv + squeeze


if __name__ == "__main__":
    key = jax.random.PRNGKey(0)
    k_in, k_par = jax.random.split(key)

    # Small but valid StyleEncoder config: n_downsample=3, dim=16, style_dim=8.
    # Spatial trajectory: 16 -> 16 -> 8 -> 4 -> 2 -> global pool -> 1x1.
    N, C, H, W = 2, 3, 16, 16
    x = jax.random.normal(k_in, (N, C, H, W), jnp.float32)
    params = init_params(k_par, in_dim=C, dim=16, n_downsample=3, style_dim=8)

    out = jax.block_until_ready(style_encoder(x, params))
    assert out.shape == (N, 8), out.shape
    assert bool(jnp.all(jnp.isfinite(out)))
    print("KERNEL_OK")
</pallas_src>

<mosaic_0001>
module attributes {stable_mosaic.version = 11 : i64} {
  func.func @_matmul_bias_act_kernel(%arg0: i32, %arg1: memref<256x160xbf16, #tpu.memory_space<vmem>>, %arg2: memref<160x16xbf16, #tpu.memory_space<vmem>>, %arg3: memref<1x16xf32, #tpu.memory_space<vmem>>, %arg4: memref<256x16xbf16, #tpu.memory_space<vmem>>) attributes {dimension_semantics = [#tpu.dimension_semantics<parallel>], iteration_bounds = array<i64: 2>, scalar_prefetch = 0 : i64, scratch_operands = 0 : i64, tpu.core_type = #tpu.core_type<tc>, window_params = [{transform_indices = @transform_0, window_bounds = array<i64: 256, 160>}, {pipeline_mode = #tpu.pipeline_mode<synchronous>, transform_indices = @transform_1, window_bounds = array<i64: 160, 16>}, {pipeline_mode = #tpu.pipeline_mode<synchronous>, transform_indices = @transform_2, window_bounds = array<i64: 1, 16>}, {transform_indices = @transform_3, window_bounds = array<i64: 256, 16>}]} {
    %c0 = arith.constant 0 : index
    %c0_0 = arith.constant 0 : index
    %0 = vector.load %arg1[%c0, %c0_0] : memref<256x160xbf16, #tpu.memory_space<vmem>>, vector<256x160xbf16>
    %c0_1 = arith.constant 0 : index
    %c0_2 = arith.constant 0 : index
    %1 = vector.load %arg2[%c0_1, %c0_2] : memref<160x16xbf16, #tpu.memory_space<vmem>>, vector<160x16xbf16>
    %cst = arith.constant dense<0.000000e+00> : vector<256x16xf32>
    %2 = tpu.matmul %0, %1, %cst {dimension_numbers = #tpu.dot_dimension_numbers<[1], [0], [0], [1], [0, 0, 1, 1], [], []>} : vector<256x160xbf16>, vector<160x16xbf16>, vector<256x16xf32> -> vector<256x16xf32>
    %c0_3 = arith.constant 0 : index
    %c0_4 = arith.constant 0 : index
    %3 = vector.load %arg3[%c0_3, %c0_4] : memref<1x16xf32, #tpu.memory_space<vmem>>, vector<1x16xf32>
    %4 = vector.broadcast %3 : vector<1x16xf32> to vector<256x16xf32>
    %5 = arith.addf %2, %4 : vector<256x16xf32>
    %cst_5 = arith.constant 0.000000e+00 : f32
    %6 = vector.broadcast %cst_5 : f32 to vector<256x16xf32>
    %7 = arith.cmpf ogt, %5, %6 : vector<256x16xf32>
    %cst_6 = arith.constant 2.000000e-01 : f32
    %8 = vector.broadcast %cst_6 : f32 to vector<256x16xf32>
    %9 = arith.mulf %8, %5 : vector<256x16xf32>
    %10 = arith.select %7, %5, %9 : vector<256x16xi1>, vector<256x16xf32>
    %11 = arith.truncf %10 : vector<256x16xf32> to vector<256x16xbf16>
    %c0_7 = arith.constant 0 : index
    %c0_8 = arith.constant 0 : index
    %12 = vector.load %arg4[%c0_7, %c0_8] : memref<256x16xbf16, #tpu.memory_space<vmem>>, vector<256x16xbf16>
    tpu.vector_store %arg4[%c0_7, %c0_8], %11 {strides = array<i32>} : memref<256x16xbf16, #tpu.memory_space<vmem>>, vector<256x16xbf16>,
    return
  }
  func.func @transform_0(%arg0: i32) -> (i32, i32) {
    %c0_i32 = arith.constant 0 : i32
    %c0_i32_0 = arith.constant 0 : i32
    return %arg0, %c0_i32 : i32, i32
  }
  func.func @transform_1(%arg0: i32) -> (i32, i32) {
    %c0_i32 = arith.constant 0 : i32
    %c0_i32_0 = arith.constant 0 : i32
    %c0_i32_1 = arith.constant 0 : i32
    return %c0_i32, %c0_i32_0 : i32, i32
  }
  func.func @transform_2(%arg0: i32) -> (i32, i32) {
    %c0_i32 = arith.constant 0 : i32
    %c0_i32_0 = arith.constant 0 : i32
    %c0_i32_1 = arith.constant 0 : i32
    return %c0_i32, %c0_i32_0 : i32, i32
  }
  func.func @transform_3(%arg0: i32) -> (i32, i32) {
    %c0_i32 = arith.constant 0 : i32
    %c0_i32_0 = arith.constant 0 : i32
    return %arg0, %c0_i32 : i32, i32
  }
}

module attributes {stable_mosaic.version = 11 : i64} {
  func.func @_matmul_bias_act_kernel(%arg0: i32, %arg1: memref<128x256xbf16, #tpu.memory_space<vmem>>, %arg2: memref<256x32xbf16, #tpu.memory_space<vmem>>, %arg3: memref<1x32xf32, #tpu.memory_space<vmem>>, %arg4: memref<128x32xbf16, #tpu.memory_space<vmem>>) attributes {dimension_semantics = [#tpu.dimension_semantics<parallel>], iteration_bounds = array<i64: 1>, scalar_prefetch = 0 : i64, scratch_operands = 0 : i64, tpu.core_type = #tpu.core_type<tc>, window_params = [{transform_indices = @transform_0, window_bounds = array<i64: 128, 256>}, {pipeline_mode = #tpu.pipeline_mode<synchronous>, transform_indices = @transform_1, window_bounds = array<i64: 256, 32>}, {pipeline_mode = #tpu.pipeline_mode<synchronous>, transform_indices = @transform_2, window_bounds = array<i64: 1, 32>}, {transform_indices = @transform_3, window_bounds = array<i64: 128, 32>}]} {
    %c0 = arith.constant 0 : index
    %c0_0 = arith.constant 0 : index
    %0 = vector.load %arg1[%c0, %c0_0] : memref<128x256xbf16, #tpu.memory_space<vmem>>, vector<128x256xbf16>
    %c0_1 = arith.constant 0 : index
    %c0_2 = arith.constant 0 : index
    %1 = vector.load %arg2[%c0_1, %c0_2] : memref<256x32xbf16, #tpu.memory_space<vmem>>, vector<256x32xbf16>
    %cst = arith.constant dense<0.000000e+00> : vector<128x32xf32>
    %2 = tpu.matmul %0, %1, %cst {dimension_numbers = #tpu.dot_dimension_numbers<[1], [0], [0], [1], [0, 0, 1, 1], [], []>} : vector<128x256xbf16>, vector<256x32xbf16>, vector<128x32xf32> -> vector<128x32xf32>
    %c0_3 = arith.constant 0 : index
    %c0_4 = arith.constant 0 : index
    %3 = vector.load %arg3[%c0_3, %c0_4] : memref<1x32xf32, #tpu.memory_space<vmem>>, vector<1x32xf32>
    %4 = vector.broadcast %3 : vector<1x32xf32> to vector<128x32xf32>
    %5 = arith.addf %2, %4 : vector<128x32xf32>
    %cst_5 = arith.constant 0.000000e+00 : f32
    %6 = vector.broadcast %cst_5 : f32 to vector<128x32xf32>
    %7 = arith.cmpf ogt, %5, %6 : vector<128x32xf32>
    %cst_6 = arith.constant 2.000000e-01 : f32
    %8 = vector.broadcast %cst_6 : f32 to vector<128x32xf32>
    %9 = arith.mulf %8, %5 : vector<128x32xf32>
    %10 = arith.select %7, %5, %9 : vector<128x32xi1>, vector<128x32xf32>
    %11 = arith.truncf %10 : vector<128x32xf32> to vector<128x32xbf16>
    %c0_7 = arith.constant 0 : index
    %c0_8 = arith.constant 0 : index
    %12 = vector.load %arg4[%c0_7, %c0_8] : memref<128x32xbf16, #tpu.memory_space<vmem>>, vector<128x32xbf16>
    tpu.vector_store %arg4[%c0_7, %c0_8], %11 {strides = array<i32>} : memref<128x32xbf16, #tpu.memory_space<vmem>>, vector<128x32xbf16>,
    return
  }
  func.func @transform_0(%arg0: i32) -> (i32, i32) {
    %c0_i32 = arith.constant 0 : i32
    %c0_i32_0 = arith.constant 0 : i32
    return %arg0, %c0_i32 : i32, i32
  }
  func.func @transform_1(%arg0: i32) -> (i32, i32) {
    %c0_i32 = arith.constant 0 : i32
    %c0_i32_0 = arith.constant 0 : i32
    %c0_i32_1 = arith.constant 0 : i32
    return %c0_i32, %c0_i32_0 : i32, i32
  }
  func.func @transform_2(%arg0: i32) -> (i32, i32) {
    %c0_i32 = arith.constant 0 : i32
    %c0_i32_0 = arith.constant 0 : i32
    %c0_i32_1 = arith.constant 0 : i32
    return %c0_i32, %c0_i32_0 : i32, i32
  }
  func.func @transform_3(%arg0: i32) -> (i32, i32) {
    %c0_i32 = arith.constant 0 : i32
    %c0_i32_0 = arith.constant 0 : i32
    return %arg0, %c0_i32 : i32, i32
  }
}

module attributes {stable_mosaic.version = 11 : i64} {
  func.func @_matmul_bias_act_kernel(%arg0: i32, %arg1: memref<32x512xbf16, #tpu.memory_space<vmem>>, %arg2: memref<512x64xbf16, #tpu.memory_space<vmem>>, %arg3: memref<1x64xf32, #tpu.memory_space<vmem>>, %arg4: memref<32x64xbf16, #tpu.memory_space<vmem>>) attributes {dimension_semantics = [#tpu.dimension_semantics<parallel>], iteration_bounds = array<i64: 1>, scalar_prefetch = 0 : i64, scratch_operands = 0 : i64, tpu.core_type = #tpu.core_type<tc>, window_params = [{transform_indices = @transform_0, window_bounds = array<i64: 32, 512>}, {pipeline_mode = #tpu.pipeline_mode<synchronous>, transform_indices = @transform_1, window_bounds = array<i64: 512, 64>}, {pipeline_mode = #tpu.pipeline_mode<synchronous>, transform_indices = @transform_2, window_bounds = array<i64: 1, 64>}, {transform_indices = @transform_3, window_bounds = array<i64: 32, 64>}]} {
    %c0 = arith.constant 0 : index
    %c0_0 = arith.constant 0 : index
    %0 = vector.load %arg1[%c0, %c0_0] : memref<32x512xbf16, #tpu.memory_space<vmem>>, vector<32x512xbf16>
    %c0_1 = arith.constant 0 : index
    %c0_2 = arith.constant 0 : index
    %1 = vector.load %arg2[%c0_1, %c0_2] : memref<512x64xbf16, #tpu.memory_space<vmem>>, vector<512x64xbf16>
    %cst = arith.constant dense<0.000000e+00> : vector<32x64xf32>
    %2 = tpu.matmul %0, %1, %cst {dimension_numbers = #tpu.dot_dimension_numbers<[1], [0], [0], [1], [0, 0, 1, 1], [], []>} : vector<32x512xbf16>, vector<512x64xbf16>, vector<32x64xf32> -> vector<32x64xf32>
    %c0_3 = arith.constant 0 : index
    %c0_4 = arith.constant 0 : index
    %3 = vector.load %arg3[%c0_3, %c0_4] : memref<1x64xf32, #tpu.memory_space<vmem>>, vector<1x64xf32>
    %4 = vector.broadcast %3 : vector<1x64xf32> to vector<32x64xf32>
    %5 = arith.addf %2, %4 : vector<32x64xf32>
    %cst_5 = arith.constant 0.000000e+00 : f32
    %6 = vector.broadcast %cst_5 : f32 to vector<32x64xf32>
    %7 = arith.cmpf ogt, %5, %6 : vector<32x64xf32>
    %cst_6 = arith.constant 2.000000e-01 : f32
    %8 = vector.broadcast %cst_6 : f32 to vector<32x64xf32>
    %9 = arith.mulf %8, %5 : vector<32x64xf32>
    %10 = arith.select %7, %5, %9 : vector<32x64xi1>, vector<32x64xf32>
    %11 = arith.truncf %10 : vector<32x64xf32> to vector<32x64xbf16>
    %c0_7 = arith.constant 0 : index
    %c0_8 = arith.constant 0 : index
    %12 = vector.load %arg4[%c0_7, %c0_8] : memref<32x64xbf16, #tpu.memory_space<vmem>>, vector<32x64xbf16>
    tpu.vector_store %arg4[%c0_7, %c0_8], %11 {strides = array<i32>} : memref<32x64xbf16, #tpu.memory_space<vmem>>, vector<32x64xbf16>,
    return
  }
  func.func @transform_0(%arg0: i32) -> (i32, i32) {
    %c0_i32 = arith.constant 0 : i32
    %c0_i32_0 = arith.constant 0 : i32
    return %arg0, %c0_i32 : i32, i32
  }
  func.func @transform_1(%arg0: i32) -> (i32, i32) {
    %c0_i32 = arith.constant 0 : i32
    %c0_i32_0 = arith.constant 0 : i32
    %c0_i32_1 = arith.constant 0 : i32
    return %c0_i32, %c0_i32_0 : i32, i32
  }
  func.func @transform_2(%arg0: i32) -> (i32, i32) {
    %c0_i32 = arith.constant 0 : i32
    %c0_i32_0 = arith.constant 0 : i32
    %c0_i32_1 = arith.constant 0 : i32
    return %c0_i32, %c0_i32_0 : i32, i32
  }
  func.func @transform_3(%arg0: i32) -> (i32, i32) {
    %c0_i32 = arith.constant 0 : i32
    %c0_i32_0 = arith.constant 0 : i32
    return %arg0, %c0_i32 : i32, i32
  }
}

module attributes {stable_mosaic.version = 11 : i64} {
  func.func @_matmul_bias_act_kernel(%arg0: i32, %arg1: memref<8x1024xbf16, #tpu.memory_space<vmem>>, %arg2: memref<1024x64xbf16, #tpu.memory_space<vmem>>, %arg3: memref<1x64xf32, #tpu.memory_space<vmem>>, %arg4: memref<8x64xbf16, #tpu.memory_space<vmem>>) attributes {dimension_semantics = [#tpu.dimension_semantics<parallel>], iteration_bounds = array<i64: 1>, scalar_prefetch = 0 : i64, scratch_operands = 0 : i64, tpu.core_type = #tpu.core_type<tc>, window_params = [{transform_indices = @transform_0, window_bounds = array<i64: 8, 1024>}, {pipeline_mode = #tpu.pipeline_mode<synchronous>, transform_indices = @transform_1, window_bounds = array<i64: 1024, 64>}, {pipeline_mode = #tpu.pipeline_mode<synchronous>, transform_indices = @transform_2, window_bounds = array<i64: 1, 64>}, {transform_indices = @transform_3, window_bounds = array<i64: 8, 64>}]} {
    %c0 = arith.constant 0 : index
    %c0_0 = arith.constant 0 : index
    %0 = vector.load %arg1[%c0, %c0_0] : memref<8x1024xbf16, #tpu.memory_space<vmem>>, vector<8x1024xbf16>
    %c0_1 = arith.constant 0 : index
    %c0_2 = arith.constant 0 : index
    %1 = vector.load %arg2[%c0_1, %c0_2] : memref<1024x64xbf16, #tpu.memory_space<vmem>>, vector<1024x64xbf16>
    %cst = arith.constant dense<0.000000e+00> : vector<8x64xf32>
    %2 = tpu.matmul %0, %1, %cst {dimension_numbers = #tpu.dot_dimension_numbers<[1], [0], [0], [1], [0, 0, 1, 1], [], []>} : vector<8x1024xbf16>, vector<1024x64xbf16>, vector<8x64xf32> -> vector<8x64xf32>
    %c0_3 = arith.constant 0 : index
    %c0_4 = arith.constant 0 : index
    %3 = vector.load %arg3[%c0_3, %c0_4] : memref<1x64xf32, #tpu.memory_space<vmem>>, vector<1x64xf32>
    %4 = vector.broadcast %3 : vector<1x64xf32> to vector<8x64xf32>
    %5 = arith.addf %2, %4 : vector<8x64xf32>
    %cst_5 = arith.constant 0.000000e+00 : f32
    %6 = vector.broadcast %cst_5 : f32 to vector<8x64xf32>
    %7 = arith.cmpf ogt, %5, %6 : vector<8x64xf32>
    %cst_6 = arith.constant 2.000000e-01 : f32
    %8 = vector.broadcast %cst_6 : f32 to vector<8x64xf32>
    %9 = arith.mulf %8, %5 : vector<8x64xf32>
    %10 = arith.select %7, %5, %9 : vector<8x64xi1>, vector<8x64xf32>
    %11 = arith.truncf %10 : vector<8x64xf32> to vector<8x64xbf16>
    %c0_7 = arith.constant 0 : index
    %c0_8 = arith.constant 0 : index
    %12 = vector.load %arg4[%c0_7, %c0_8] : memref<8x64xbf16, #tpu.memory_space<vmem>>, vector<8x64xbf16>
    tpu.vector_store %arg4[%c0_7, %c0_8], %11 {strides = array<i32>} : memref<8x64xbf16, #tpu.memory_space<vmem>>, vector<8x64xbf16>,
    return
  }
  func.func @transform_0(%arg0: i32) -> (i32, i32) {
    %c0_i32 = arith.constant 0 : i32
    %c0_i32_0 = arith.constant 0 : i32
    return %arg0, %c0_i32 : i32, i32
  }
  func.func @transform_1(%arg0: i32) -> (i32, i32) {
    %c0_i32 = arith.constant 0 : i32
    %c0_i32_0 = arith.constant 0 : i32
    %c0_i32_1 = arith.constant 0 : i32
    return %c0_i32, %c0_i32_0 : i32, i32
  }
  func.func @transform_2(%arg0: i32) -> (i32, i32) {
    %c0_i32 = arith.constant 0 : i32
    %c0_i32_0 = arith.constant 0 : i32
    %c0_i32_1 = arith.constant 0 : i32
    return %c0_i32, %c0_i32_0 : i32, i32
  }
  func.func @transform_3(%arg0: i32) -> (i32, i32) {
    %c0_i32 = arith.constant 0 : i32
    %c0_i32_0 = arith.constant 0 : i32
    return %arg0, %c0_i32 : i32, i32
  }
}

module attributes {stable_mosaic.version = 11 : i64} {
  func.func @_pool_linear_kernel(%arg0: i32, %arg1: memref<2x4x64xbf16, #tpu.memory_space<vmem>>, %arg2: memref<64x128xf32, #tpu.memory_space<vmem>>, %arg3: memref<1x128xf32, #tpu.memory_space<vmem>>, %arg4: memref<2x128xf32, #tpu.memory_space<vmem>>) attributes {dimension_semantics = [#tpu.dimension_semantics<arbitrary>], iteration_bounds = array<i64: 1>, scalar_prefetch = 0 : i64, scratch_operands = 0 : i64, tpu.core_type = #tpu.core_type<tc>, window_params = [{pipeline_mode = #tpu.pipeline_mode<synchronous>, transform_indices = @transform_0, window_bounds = array<i64: 2, 4, 64>}, {pipeline_mode = #tpu.pipeline_mode<synchronous>, transform_indices = @transform_1, window_bounds = array<i64: 64, 128>}, {pipeline_mode = #tpu.pipeline_mode<synchronous>, transform_indices = @transform_2, window_bounds = array<i64: 1, 128>}, {pipeline_mode = #tpu.pipeline_mode<synchronous>, transform_indices = @transform_3, window_bounds = array<i64: 2, 128>}]} {
    %c0 = arith.constant 0 : index
    %c0_0 = arith.constant 0 : index
    %c0_1 = arith.constant 0 : index
    %0 = vector.load %arg1[%c0, %c0_0, %c0_1] : memref<2x4x64xbf16, #tpu.memory_space<vmem>>, vector<2x4x64xbf16>
    %1 = arith.extf %0 : vector<2x4x64xbf16> to vector<2x4x64xf32>
    %cst = arith.constant dense<0.000000e+00> : vector<2x64xf32>
    %2 = vector.multi_reduction <add>, %1, %cst [1] : vector<2x4x64xf32> to vector<2x64xf32>
    %cst_2 = arith.constant 2.500000e-01 : f32
    %3 = vector.broadcast %cst_2 : f32 to vector<2x64xf32>
    %4 = arith.mulf %2, %3 : vector<2x64xf32>
    %c0_3 = arith.constant 0 : index
    %c0_4 = arith.constant 0 : index
    %5 = vector.load %arg2[%c0_3, %c0_4] : memref<64x128xf32, #tpu.memory_space<vmem>>, vector<64x128xf32>
    %cst_5 = arith.constant dense<0.000000e+00> : vector<2x128xf32>
    %6 = tpu.matmul %4, %5, %cst_5 {dimension_numbers = #tpu.dot_dimension_numbers<[1], [0], [0], [1], [0, 0, 1, 1], [], []>} : vector<2x64xf32>, vector<64x128xf32>, vector<2x128xf32> -> vector<2x128xf32>
    %c0_6 = arith.constant 0 : index
    %c0_7 = arith.constant 0 : index
    %7 = vector.load %arg3[%c0_6, %c0_7] : memref<1x128xf32, #tpu.memory_space<vmem>>, vector<1x128xf32>
    %8 = vector.broadcast %7 : vector<1x128xf32> to vector<2x128xf32>
    %9 = arith.addf %6, %8 : vector<2x128xf32>
    %c0_8 = arith.constant 0 : index
    %c0_9 = arith.constant 0 : index
    %10 = vector.load %arg4[%c0_8, %c0_9] : memref<2x128xf32, #tpu.memory_space<vmem>>, vector<2x128xf32>
    tpu.vector_store %arg4[%c0_8, %c0_9], %9 {strides = array<i32>} : memref<2x128xf32, #tpu.memory_space<vmem>>, vector<2x128xf32>,
    return
  }
  func.func @transform_0(%arg0: i32) -> (i32, i32, i32) {
    %c0_i32 = arith.constant 0 : i32
    %c0_i32_0 = arith.constant 0 : i32
    %c0_i32_1 = arith.constant 0 : i32
    %c0_i32_2 = arith.constant 0 : i32
    return %c0_i32, %c0_i32_0, %c0_i32_1 : i32, i32, i32
  }
  func.func @transform_1(%arg0: i32) -> (i32, i32) {
    %c0_i32 = arith.constant 0 : i32
    %c0_i32_0 = arith.constant 0 : i32
    %c0_i32_1 = arith.constant 0 : i32
    return %c0_i32, %c0_i32_0 : i32, i32
  }
  func.func @transform_2(%arg0: i32) -> (i32, i32) {
    %c0_i32 = arith.constant 0 : i32
    %c0_i32_0 = arith.constant 0 : i32
    %c0_i32_1 = arith.constant 0 : i32
    return %c0_i32, %c0_i32_0 : i32, i32
  }
  func.func @transform_3(%arg0: i32) -> (i32, i32) {
    %c0_i32 = arith.constant 0 : i32
    %c0_i32_0 = arith.constant 0 : i32
    %c0_i32_1 = arith.constant 0 : i32
    return %c0_i32, %c0_i32_0 : i32, i32
  }
}

</mosaic_0001>

<bundles_post_ra>
// kernel: style_encoder.5
= control target key start
LH: loop header
LB: loop body
LE: loop exit
PB: predicated region body
PF: predicated region fallthrough
CT: control target
= control target key end

     0   :  { %s1216_s12 = smov 0   ;;  %s1420_s0 = inlined_call_operand.vmem [shape: bf16[512,160], index: 0, kind: input, shape index: {}]   ;;  %s1421_s1 = inlined_call_operand.vmem [shape: bf16[160,16], index: 1, kind: input, shape index: {}]   ;;  %s1422_s2 = inlined_call_operand.vmem [shape: f32[1,16], index: 2, kind: input, shape index: {}]   ;;  %s1423_s3 = inlined_call_operand.vmem [shape: bf16[512,16], index: 3, kind: output, shape index: {}]  }
   0x1 LB: > { %s964_s13 = sadd.s32 4294967295, %s1193_s12   ;;  %p968_p0 = scmp.ge.s32.totalorder %s1193_s12, 1  ;;  %s1193_s12 = sphi %s1216_s12, %s13_s12  }
   0x2   : > { %p139_p1 = scmp.lt.s32.totalorder %s1193_s12, 3 }
   0x4   : > { %p140_p2 = pnand %p968_p0, %p139_p1 }
   0x5   : > { %s969_s16 = sshll.u32 (!%p140_p2), %s964_s13, 5 }
   0x6   : > { %143 = sbr.rel (%p140_p2) target bundleno = 313 (0x139), region = 32  ;;  %p165_p3 = scmp.lt.s32.totalorder (!%p140_p2), %s969_s16, 63 }
   0xb   : > { %v1129_v0 = vld [vmem:[%s1421_s1 + $0x38] sm:$0xff]   ;;  %v1195_v1 = vmov 0   ;;  %v1130_v2 = vld [vmem:[%s1421_s1 + $0x30] sm:$0xff]   ;;  %s1425_s16 = smov (!%p165_p3, %s969_s16), 63  ;;  %v1131_v3 = vld [vmem:[%s1421_s1 + $0x28] sm:$0xff]   ;;  %vm441_vm0 = vcmask 261120  }
   0xc   : > { %490 = vmatprep.subr.bf16.mxu0 %v1195_v1  ;;  %1100 = vmatprep.subr.bf16.mxu1 %v1195_v1  ;;  %s1067_s21 = sshll.u32 %s1425_s16, 3  ;;  %v1132_v4 = vld [vmem:[%s1421_s1 + $0x20] sm:$0xff]   ;;  %v1133_v7 = vld [vmem:[%s1421_s1 + $0x18] sm:$0xff]   ;;  %v1134_v8 = vld [vmem:[%s1421_s1 + $0x10] sm:$0xff]   ;;  %s973_s15 = sshll.u32 %s1425_s16, 2  ;;  %vm875_vm3 = vcmask 125952  }
   0xd   : > { %491 = vmatpush1.bf16.msra.mxu0 %v1129_v0  ;;  %1110 = vmatpush1.bf16.msra.mxu1 %v1129_v0  ;;  %s1239_s24 = scalar_lea.vmem %s1420_s0, %s1067_s21  ;;  %v1135_v9 = vld [vmem:[%s1421_s1 + $0x8] sm:$0xff]   ;;  %v1136_v10 = vld [vmem:[%s1421_s1] sm:$0xff]   ;;  %s1321_s19 = scalar_lea.vmem %s1423_s3, %s973_s15 }
   0xe   : > { %492 = vmatprep.subr.bf16.mxu0 %v1195_v1  ;;  %1101 = vmatprep.subr.bf16.mxu1 %v1195_v1  ;;  %v1141_v5 = vld [vmem:[%s1239_s24 + $0x4] ss:$8 sps:$4 sm:$0xff]   ;;  %v1139_v13 = vld [vmem:[%s1239_s24] ss:$8 sps:$4 sm:$0xff]   ;;  %v1145_v15 = vld [vmem:[%s1239_s24 + $0x14] ss:$8 sps:$4 sm:$0xff]  }
   0xf   : > { %v1144_v6 = vld [vmem:[%s1239_s24 + $0x84] ss:$8 sps:$4 sm:$0xff]   ;;  %1017 = vmatprep.mubr.msk.bf16.mxu0 %vm441_vm0, %v1141_v5  ;;  %v1142_v14 = vld [vmem:[%s1239_s24 + $0x80] ss:$8 sps:$4 sm:$0xff]   ;;  %v1147_v16 = vld [vmem:[%s1239_s24 + $0x94] ss:$8 sps:$4 sm:$0xff]  }
  0x10   : > { %1025 = vmatprep.mubr.msk.bf16.mxu1 %vm441_vm0, %v1144_v6  ;;  %v1137_v11 = vld [vmem:[%s1421_s1 + $0x48] sm:$0xff]   ;;  %v1138_v12 = vld [vmem:[%s1421_s1 + $0x40] sm:$0xff]   ;;  %v1149_v17 = vld [vmem:[%s1239_s24 + $0x10] ss:$8 sps:$4 sm:$0xff]  }
  0x11   : > { %493 = vmatpush1.bf16.msra.mxu0 %v1130_v2  ;;  %1111 = vmatpush1.bf16.msra.mxu1 %v1130_v2  ;;  %v1150_v18 = vld [vmem:[%s1239_s24 + $0x90] ss:$8 sps:$4 sm:$0xff]   ;;  %v1151_v19 = vld [vmem:[%s1239_s24 + $0x24] ss:$8 sps:$4 sm:$0xff]   ;;  %v1155_v21 = vld [vmem:[%s1239_s24 + $0x20] ss:$8 sps:$4 sm:$0xff]  }
  0x12   : > { %494 = vmatprep.subr.bf16.mxu0 %v1195_v1  ;;  %1102 = vmatprep.subr.bf16.mxu1 %v1195_v1  ;;  %v1153_v20 = vld [vmem:[%s1239_s24 + $0xa4] ss:$8 sps:$4 sm:$0xff]   ;;  %v1156_v22 = vld [vmem:[%s1239_s24 + $0xa0] ss:$8 sps:$4 sm:$0xff]   ;;  %v1157_v23 = vld [vmem:[%s1239_s24 + $0x34] ss:$8 sps:$4 sm:$0xff]  }
  0x13   : > { %v1159_v24 = vld [vmem:[%s1239_s24 + $0xb4] ss:$8 sps:$4 sm:$0xff]   ;;  %v1161_v25 = vld [vmem:[%s1239_s24 + $0x30] ss:$8 sps:$4 sm:$0xff]   ;;  %v1163_v27 = vld [vmem:[%s1239_s24 + $0x44] ss:$8 sps:$4 sm:$0xff]  }
  0x14   : > { %v1162_v26 = vld [vmem:[%s1239_s24 + $0xb0] ss:$8 sps:$4 sm:$0xff]   ;;  %v1165_v28 = vld [vmem:[%s1239_s24 + $0xc4] ss:$8 sps:$4 sm:$0xff]   ;;  %v1167_v29 = vld [vmem:[%s1239_s24 + $0x40] ss:$8 sps:$4 sm:$0xff]  }
  0x15   : > { %495 = vmatpush1.bf16.msra.mxu0 %v1131_v3  ;;  %1112 = vmatpush1.bf16.msra.mxu1 %v1131_v3  ;;  %v1168_v30 = vld [vmem:[%s1239_s24 + $0xc0] ss:$8 sps:$4 sm:$0xff]   ;;  %v1169_v31 = vld [vmem:[%s1239_s24 + $0x54] ss:$8 sps:$4 sm:$0xff]   ;;  %v1173_v33 = vld [vmem:[%s1239_s24 + $0x50] ss:$8 sps:$4 sm:$0xff]  }
  0x16   : > { %496 = vmatprep.subr.bf16.mxu0 %v1195_v1  ;;  %1103 = vmatprep.subr.bf16.mxu1 %v1195_v1  ;;  %v1171_v32 = vld [vmem:[%s1239_s24 + $0xd4] ss:$8 sps:$4 sm:$0xff]   ;;  %v1174_v34 = vld [vmem:[%s1239_s24 + $0xd0] ss:$8 sps:$4 sm:$0xff]   ;;  %v1175_v35 = vld [vmem:[%s1239_s24 + $0x64] ss:$8 sps:$4 sm:$0xff]  }
  0x17   : > { %v1177_v36 = vld [vmem:[%s1239_s24 + $0xe4] ss:$8 sps:$4 sm:$0xff]   ;;  %v1179_v37 = vld [vmem:[%s1239_s24 + $0x60] ss:$8 sps:$4 sm:$0xff]   ;;  %v1181_v39 = vld [vmem:[%s1239_s24 + $0x74] ss:$8 sps:$4 sm:$0xff]  }
  0x18   : > { %v1180_v38 = vld [vmem:[%s1239_s24 + $0xe0] ss:$8 sps:$4 sm:$0xff]   ;;  %v1183_v40 = vld [vmem:[%s1239_s24 + $0xf4] ss:$8 sps:$4 sm:$0xff]   ;;  %v1185_v41 = vld [vmem:[%s1239_s24 + $0x70] ss:$8 sps:$4 sm:$0xff]  }
  0x19   : > { %497 = vmatpush1.bf16.msra.mxu0 %v1132_v4  ;;  %1113 = vmatpush1.bf16.msra.mxu1 %v1132_v4  ;;  %v1186_v42 = vld [vmem:[%s1239_s24 + $0xf0] ss:$8 sps:$4 sm:$0xff]   ;;  %v1313_v43 = vld [vmem:[%s1422_s2] ss:$0 sm:$0xff] }
  0x1a   : > { %498 = vmatprep.subr.bf16.mxu0 %v1195_v1  ;;  %1104 = vmatprep.subr.bf16.mxu1 %v1195_v1 }
  0x1d   : > { %499 = vmatpush1.bf16.msra.mxu0 %v1133_v7  ;;  %1114 = vmatpush1.bf16.msra.mxu1 %v1133_v7 }
  0x1e   : > { %500 = vmatprep.subr.bf16.mxu0 %v1195_v1  ;;  %1105 = vmatprep.subr.bf16.mxu1 %v1195_v1 }
  0x21   : > { %501 = vmatpush1.bf16.msra.mxu0 %v1134_v8  ;;  %1115 = vmatpush1.bf16.msra.mxu1 %v1134_v8 }
  0x22   : > { %502 = vmatprep.subr.bf16.mxu0 %v1195_v1  ;;  %1106 = vmatprep.subr.bf16.mxu1 %v1195_v1 }
  0x25   : > { %503 = vmatpush1.bf16.msra.mxu0 %v1135_v9  ;;  %1116 = vmatpush1.bf16.msra.mxu1 %v1135_v9 }
  0x26   : > { %504 = vmatprep.subr.bf16.mxu0 %v1195_v1  ;;  %1107 = vmatprep.subr.bf16.mxu1 %v1195_v1 }
  0x29   : > { %505 = vmatpush1.bf16.msra.mxu0 %v1136_v10  ;;  %1117 = vmatpush1.bf16.msra.mxu1 %v1136_v10 }
  0x2a   : > { %518 = vmatprep.subr.bf16.mxu0 %v1195_v1  ;;  %1108 = vmatprep.subr.bf16.mxu1 %v1195_v1 }
  0x2d   : > { %519 = vmatpush2.bf16.msra.mxu0 %v1137_v11  ;;  %1118 = vmatpush2.bf16.msra.mxu1 %v1137_v11 }
  0x2e   : > { %520 = vmatprep.subr.bf16.mxu0 %v1195_v1  ;;  %1109 = vmatprep.subr.bf16.mxu1 %v1195_v1 }
  0x31   : > { %521 = vmatpush2.bf16.msra.mxu0 %v1138_v12  ;;  %1119 = vmatpush2.bf16.msra.mxu1 %v1138_v12 }
  0x34   : > { %523 = vmatmul.mubr.bf16.vlgmr.msra.gmra.mxu0 %v1139_v13  ;;  %587 = vmatmul.mubr.bf16.vlgmr.msra.gmra.mxu1 %v1142_v14 }
  0x35   : > { %1018 = vmatprep.mubr.msk.bf16.mxu0 %vm441_vm0, %v1145_v15  ;;  %1026 = vmatprep.mubr.msk.bf16.mxu1 %vm441_vm0, %v1147_v16 }
  0x3c   : > { %531 = vmatmul.mubr.bf16.gmra.mxu0 %v1149_v17  ;;  %595 = vmatmul.mubr.bf16.gmra.mxu1 %v1150_v18 }
  0x3d   : > { %1019 = vmatprep.mubr.msk.bf16.mxu0 %vm441_vm0, %v1151_v19  ;;  %1027 = vmatprep.mubr.msk.bf16.mxu1 %vm441_vm0, %v1153_v20 }
  0x44   : > { %539 = vmatmul.mubr.bf16.gmra.mxu0 %v1155_v21  ;;  %603 = vmatmul.mubr.bf16.gmra.mxu1 %v1156_v22 }
  0x45   : > { %1020 = vmatprep.mubr.msk.bf16.mxu0 %vm441_vm0, %v1157_v23  ;;  %1028 = vmatprep.mubr.msk.bf16.mxu1 %vm441_vm0, %v1159_v24 }
  0x4c   : > { %547 = vmatmul.mubr.bf16.gmra.mxu0 %v1161_v25  ;;  %611 = vmatmul.mubr.bf16.gmra.mxu1 %v1162_v26 }
  0x4d   : > { %1021 = vmatprep.mubr.msk.bf16.mxu0 %vm441_vm0, %v1163_v27  ;;  %1029 = vmatprep.mubr.msk.bf16.mxu1 %vm441_vm0, %v1165_v28 }
  0x54   : > { %555 = vmatmul.mubr.bf16.gmra.mxu0 %v1167_v29  ;;  %619 = vmatmul.mubr.bf16.gmra.mxu1 %v1168_v30 }
  0x55   : > { %1022 = vmatprep.mubr.msk.bf16.mxu0 %vm441_vm0, %v1169_v31  ;;  %1030 = vmatprep.mubr.msk.bf16.mxu1 %vm441_vm0, %v1171_v32 }
  0x5c   : > { %563 = vmatmul.mubr.bf16.gmra.mxu0 %v1173_v33  ;;  %627 = vmatmul.mubr.bf16.gmra.mxu1 %v1174_v34 }
  0x5d   : > { %1023 = vmatprep.mubr.msk.bf16.mxu0 %vm441_vm0, %v1175_v35  ;;  %1031 = vmatprep.mubr.msk.bf16.mxu1 %vm441_vm0, %v1177_v36 }
  0x64   : > { %571 = vmatmul.mubr.bf16.gmra.mxu0 %v1179_v37  ;;  %635 = vmatmul.mubr.bf16.gmra.mxu1 %v1180_v38 }
  0x65   : > { %1024 = vmatprep.mubr.msk.bf16.mxu0 %vm441_vm0, %v1181_v39  ;;  %1032 = vmatprep.mubr.msk.bf16.mxu1 %vm441_vm0, %v1183_v40 }
  0x6c   : > { %579 = vmatmul.mubr.bf16.gmra.mxu0 %v1185_v41  ;;  %643 = vmatmul.mubr.bf16.gmra.mxu1 %v1186_v42 }
  0xf4   : > { %v524_v44 = vpop.f32.mrf.mxu0  ;;  %v588_v45 = vpop.f32.mrf.mxu1 }
  0xf5   : > { %v525_v46 = vadd.f32 %v1313_v43, %v524_v44  ;;  %v589_v47 = vadd.f32 %v1313_v43, %v588_v45 }
  0xf6   : > { %v526_v48 = vpop.f32.mrf.mxu0  ;;  %v590_v49 = vpop.f32.mrf.mxu1 }
  0xf7   : > { %vm651_vm1 = vcmp.gt.f32.partialorder %v525_v46, 0.0  ;;  %v683_v50 = vmul.f32 0.2, %v525_v46  ;;  %vm667_vm2 = vcmp.gt.f32.partialorder %v589_v47, 0.0  ;;  %v699_v51 = vmul.f32 0.2, %v589_v47 }
  0xf8   : > { %v527_v52 = vpop.f32.mrf.mxu0  ;;  %v591_v53 = vpop.f32.mrf.mxu1 }
  0xf9   : > { %v715_v54 = vsel %vm651_vm1, %v525_v46, %v683_v50  ;;  %v731_v55 = vsel %vm667_vm2, %v589_v47, %v699_v51  ;;  %v528_v56 = vadd.f32 %v1313_v43, %v527_v52  ;;  %v592_v57 = vadd.f32 %v1313_v43, %v591_v53 }
  0xfa   : > { %v1068_v58 = vpack.c.bf16 %v715_v54, %v715_v54  ;;  %v1084_v59 = vpack.c.bf16 %v731_v55, %v731_v55  ;;  %v529_v60 = vpop.f32.mrf.mxu0  ;;  %v593_v61 = vpop.f32.mrf.mxu1 }
  0xfb   : > { %vm652_vm4 = vcmp.gt.f32.partialorder %v528_v56, 0.0  ;;  %v684_v62 = vmul.f32 0.2, %v528_v56  ;;  %vm668_vm5 = vcmp.gt.f32.partialorder %v592_v57, 0.0  ;;  %v700_v63 = vmul.f32 0.2, %v592_v57 }
  0xfc   : > { %876 = vst.msk [vmem:[%s1321_s19] sm:$0xf] %vm875_vm3, %v1068_v58  ;;  %892 = vst.msk [vmem:[%s1321_s19 + $0x40] sm:$0xf] %vm875_vm3, %v1084_v59  ;;  %v532_v0 = vpop.f32.mrf.mxu0  ;;  %v596_v1 = vpop.f32.mrf.mxu1 }
  0xfd   : > { %v716_v2 = vsel %vm652_vm4, %v528_v56, %v684_v62  ;;  %v732_v3 = vsel %vm668_vm5, %v592_v57, %v700_v63  ;;  %v533_v4 = vadd.f32 %v1313_v43, %v532_v0  ;;  %v597_v5 = vadd.f32 %v1313_v43, %v596_v1 }
  0xfe   : > { %v1069_v6 = vpack.c.bf16 %v716_v2, %v716_v2  ;;  %v1085_v7 = vpack.c.bf16 %v732_v3, %v732_v3  ;;  %v534_v8 = vpop.f32.mrf.mxu0  ;;  %v598_v9 = vpop.f32.mrf.mxu1 }
  0xff   : > { %vm653_vm6 = vcmp.gt.f32.partialorder %v533_v4, 0.0  ;;  %v685_v10 = vmul.f32 0.2, %v533_v4  ;;  %vm669_vm7 = vcmp.gt.f32.partialorder %v597_v5, 0.0  ;;  %v701_v11 = vmul.f32 0.2, %v597_v5 }
 0x100   : > { %877 = vst.msk [vmem:[%s1321_s19 + $0x4] sm:$0xf] %vm875_vm3, %v1069_v6  ;;  %893 = vst.msk [vmem:[%s1321_s19 + $0x44] sm:$0xf] %vm875_vm3, %v1085_v7  ;;  %v535_v12 = vpop.f32.mrf.mxu0  ;;  %v599_v13 = vpop.f32.mrf.mxu1 }
 0x101   : > { %v717_v14 = vsel %vm653_vm6, %v533_v4, %v685_v10  ;;  %v733_v15 = vsel %vm669_vm7, %v597_v5, %v701_v11  ;;  %v536_v16 = vadd.f32 %v1313_v43, %v535_v12  ;;  %v600_v17 = vadd.f32 %v1313_v43, %v599_v13 }
 0x102   : > { %v1070_v18 = vpack.c.bf16 %v717_v14, %v717_v14  ;;  %v1086_v19 = vpack.c.bf16 %v733_v15, %v733_v15  ;;  %v537_v20 = vpop.f32.mrf.mxu0  ;;  %v601_v21 = vpop.f32.mrf.mxu1 }
 0x103   : > { %vm654_vm8 = vcmp.gt.f32.partialorder %v536_v16, 0.0  ;;  %v686_v22 = vmul.f32 0.2, %v536_v16  ;;  %vm670_vm9 = vcmp.gt.f32.partialorder %v600_v17, 0.0  ;;  %v702_v23 = vmul.f32 0.2, %v600_v17 }
 0x104   : > { %878 = vst.msk [vmem:[%s1321_s19 + $0x8] sm:$0xf] %vm875_vm3, %v1070_v18  ;;  %894 = vst.msk [vmem:[%s1321_s19 + $0x48] sm:$0xf] %vm875_vm3, %v1086_v19  ;;  %v540_v24 = vpop.f32.mrf.mxu0  ;;  %v604_v25 = vpop.f32.mrf.mxu1 }
 0x105   : > { %v718_v26 = vsel %vm654_vm8, %v536_v16, %v686_v22  ;;  %v734_v27 = vsel %vm670_vm9, %v600_v17, %v702_v23  ;;  %v541_v28 = vadd.f32 %v1313_v43, %v540_v24  ;;  %v605_v29 = vadd.f32 %v1313_v43, %v604_v25 }
 0x106   : > { %v1071_v30 = vpack.c.bf16 %v718_v26, %v718_v26  ;;  %v1087_v31 = vpack.c.bf16 %v734_v27, %v734_v27  ;;  %v542_v32 = vpop.f32.mrf.mxu0  ;;  %v606_v33 = vpop.f32.mrf.mxu1 }
 0x107   : > { %vm655_vm10 = vcmp.gt.f32.partialorder %v541_v28, 0.0  ;;  %v687_v34 = vmul.f32 0.2, %v541_v28  ;;  %vm671_vm11 = vcmp.gt.f32.partialorder %v605_v29, 0.0  ;;  %v703_v35 = vmul.f32 0.2, %v605_v29 }
 0x108   : > { %879 = vst.msk [vmem:[%s1321_s19 + $0xc] sm:$0xf] %vm875_vm3, %v1071_v30  ;;  %895 = vst.msk [vmem:[%s1321_s19 + $0x4c] sm:$0xf] %vm875_vm3, %v1087_v31  ;;  %v543_v36 = vpop.f32.mrf.mxu0  ;;  %v607_v37 = vpop.f32.mrf.mxu1 }
 0x109   : > { %v719_v38 = vsel %vm655_vm10, %v541_v28, %v687_v34  ;;  %v735_v39 = vsel %vm671_vm11, %v605_v29, %v703_v35  ;;  %v544_v40 = vadd.f32 %v1313_v43, %v543_v36  ;;  %v608_v41 = vadd.f32 %v1313_v43, %v607_v37 }
 0x10a   : > { %v1072_v42 = vpack.c.bf16 %v719_v38, %v719_v38  ;;  %v1088_v44 = vpack.c.bf16 %v735_v39, %v735_v39  ;;  %v545_v45 = vpop.f32.mrf.mxu0  ;;  %v609_v46 = vpop.f32.mrf.mxu1 }
 0x10b   : > { %vm656_vm12 = vcmp.gt.f32.partialorder %v544_v40, 0.0  ;;  %v688_v47 = vmul.f32 0.2, %v544_v40  ;;  %vm672_vm13 = vcmp.gt.f32.partialorder %v608_v41, 0.0  ;;  %v704_v48 = vmul.f32 0.2, %v608_v41 }
 0x10c   : > { %880 = vst.msk [vmem:[%s1321_s19 + $0x10] sm:$0xf] %vm875_vm3, %v1072_v42  ;;  %896 = vst.msk [vmem:[%s1321_s19 + $0x50] sm:$0xf] %vm875_vm3, %v1088_v44  ;;  %v548_v49 = vpop.f32.mrf.mxu0  ;;  %v612_v50 = vpop.f32.mrf.mxu1 }
 0x10d   : > { %v720_v51 = vsel %vm656_vm12, %v544_v40, %v688_v47  ;;  %v736_v52 = vsel %vm672_vm13, %v608_v41, %v704_v48  ;;  %v549_v53 = vadd.f32 %v1313_v43, %v548_v49  ;;  %v613_v54 = vadd.f32 %v1313_v43, %v612_v50 }
 0x10e   : > { %v1073_v55 = vpack.c.bf16 %v720_v51, %v720_v51  ;;  %v1089_v56 = vpack.c.bf16 %v736_v52, %v736_v52  ;;  %v550_v57 = vpop.f32.mrf.mxu0  ;;  %v614_v58 = vpop.f32.mrf.mxu1 }
 0x10f   : > { %vm657_vm14 = vcmp.gt.f32.partialorder %v549_v53, 0.0  ;;  %v689_v59 = vmul.f32 0.2, %v549_v53  ;;  %vm673_vm15 = vcmp.gt.f32.partialorder %v613_v54, 0.0  ;;  %v705_v60 = vmul.f32 0.2, %v613_v54 }
 0x110   : > { %881 = vst.msk [vmem:[%s1321_s19 + $0x14] sm:$0xf] %vm875_vm3, %v1073_v55  ;;  %897 = vst.msk [vmem:[%s1321_s19 + $0x54] sm:$0xf] %vm875_vm3, %v1089_v56  ;;  %v551_v61 = vpop.f32.mrf.mxu0  ;;  %v615_v62 = vpop.f32.mrf.mxu1 }
 0x111   : > { %v721_v63 = vsel %vm657_vm14, %v549_v53, %v689_v59  ;;  %v737_v0 = vsel %vm673_vm15, %v613_v54, %v705_v60  ;;  %v552_v1 = vadd.f32 %v1313_v43, %v551_v61  ;;  %v616_v2 = vadd.f32 %v1313_v43, %v615_v62 }
 0x112   : > { %v1074_v3 = vpack.c.bf16 %v721_v63, %v721_v63  ;;  %v1090_v4 = vpack.c.bf16 %v737_v0, %v737_v0  ;;  %v553_v5 = vpop.f32.mrf.mxu0  ;;  %v617_v6 = vpop.f32.mrf.mxu1 }
 0x113   : > { %vm658_vm0 = vcmp.gt.f32.partialorder %v552_v1, 0.0  ;;  %v690_v7 = vmul.f32 0.2, %v552_v1  ;;  %vm674_vm1 = vcmp.gt.f32.partialorder %v616_v2, 0.0  ;;  %v706_v8 = vmul.f32 0.2, %v616_v2 }
 0x114   : > { %882 = vst.msk [vmem:[%s1321_s19 + $0x18] sm:$0xf] %vm875_vm3, %v1074_v3  ;;  %898 = vst.msk [vmem:[%s1321_s19 + $0x58] sm:$0xf] %vm875_vm3, %v1090_v4  ;;  %v556_v9 = vpop.f32.mrf.mxu0  ;;  %v620_v10 = vpop.f32.mrf.mxu1 }
 0x115   : > { %v722_v11 = vsel %vm658_vm0, %v552_v1, %v690_v7  ;;  %v738_v12 = vsel %vm674_vm1, %v616_v2, %v706_v8  ;;  %v557_v13 = vadd.f32 %v1313_v43, %v556_v9  ;;  %v621_v14 = vadd.f32 %v1313_v43, %v620_v10 }
 0x116   : > { %v1075_v15 = vpack.c.bf16 %v722_v11, %v722_v11  ;;  %v1091_v16 = vpack.c.bf16 %v738_v12, %v738_v12  ;;  %v558_v17 = vpop.f32.mrf.mxu0  ;;  %v622_v18 = vpop.f32.mrf.mxu1 }
 0x117   : > { %vm659_vm2 = vcmp.gt.f32.partialorder %v557_v13, 0.0  ;;  %v691_v19 = vmul.f32 0.2, %v557_v13  ;;  %vm675_vm4 = vcmp.gt.f32.partialorder %v621_v14, 0.0  ;;  %v707_v20 = vmul.f32 0.2, %v621_v14 }
 0x118   : > { %883 = vst.msk [vmem:[%s1321_s19 + $0x1c] sm:$0xf] %vm875_vm3, %v1075_v15  ;;  %899 = vst.msk [vmem:[%s1321_s19 + $0x5c] sm:$0xf] %vm875_vm3, %v1091_v16  ;;  %v559_v21 = vpop.f32.mrf.mxu0  ;;  %v623_v22 = vpop.f32.mrf.mxu1 }
 0x119   : > { %v723_v23 = vsel %vm659_vm2, %v557_v13, %v691_v19  ;;  %v739_v24 = vsel %vm675_vm4, %v621_v14, %v707_v20  ;;  %v560_v25 = vadd.f32 %v1313_v43, %v559_v21  ;;  %v624_v26 = vadd.f32 %v1313_v43, %v623_v22 }
 0x11a   : > { %v1076_v27 = vpack.c.bf16 %v723_v23, %v723_v23  ;;  %v1092_v28 = vpack.c.bf16 %v739_v24, %v739_v24  ;;  %v561_v29 = vpop.f32.mrf.mxu0  ;;  %v625_v30 = vpop.f32.mrf.mxu1 }
 0x11b   : > { %vm660_vm5 = vcmp.gt.f32.partialorder %v560_v25, 0.0  ;;  %v692_v31 = vmul.f32 0.2, %v560_v25  ;;  %vm676_vm6 = vcmp.gt.f32.partialorder %v624_v26, 0.0  ;;  %v708_v32 = vmul.f32 0.2, %v624_v26 }
 0x11c   : > { %884 = vst.msk [vmem:[%s1321_s19 + $0x20] sm:$0xf] %vm875_vm3, %v1076_v27  ;;  %900 = vst.msk [vmem:[%s1321_s19 + $0x60] sm:$0xf] %vm875_vm3, %v1092_v28  ;;  %v564_v33 = vpop.f32.mrf.mxu0  ;;  %v628_v34 = vpop.f32.mrf.mxu1 }
 0x11d   : > { %v724_v35 = vsel %vm660_vm5, %v560_v25, %v692_v31  ;;  %v740_v36 = vsel %vm676_vm6, %v624_v26, %v708_v32  ;;  %v565_v37 = vadd.f32 %v1313_v43, %v564_v33  ;;  %v629_v38 = vadd.f32 %v1313_v43, %v628_v34 }
 0x11e   : > { %v1077_v39 = vpack.c.bf16 %v724_v35, %v724_v35  ;;  %v1093_v40 = vpack.c.bf16 %v740_v36, %v740_v36  ;;  %v566_v41 = vpop.f32.mrf.mxu0  ;;  %v630_v42 = vpop.f32.mrf.mxu1 }
 0x11f   : > { %vm661_vm7 = vcmp.gt.f32.partialorder %v565_v37, 0.0  ;;  %v693_v44 = vmul.f32 0.2, %v565_v37  ;;  %vm677_vm8 = vcmp.gt.f32.partialorder %v629_v38, 0.0  ;;  %v709_v45 = vmul.f32 0.2, %v629_v38 }
 0x120   : > { %885 = vst.msk [vmem:[%s1321_s19 + $0x24] sm:$0xf] %vm875_vm3, %v1077_v39  ;;  %901 = vst.msk [vmem:[%s1321_s19 + $0x64] sm:$0xf] %vm875_vm3, %v1093_v40  ;;  %v567_v46 = vpop.f32.mrf.mxu0  ;;  %v631_v47 = vpop.f32.mrf.mxu1 }
 0x121   : > { %v725_v48 = vsel %vm661_vm7, %v565_v37, %v693_v44  ;;  %v741_v49 = vsel %vm677_vm8, %v629_v38, %v709_v45  ;;  %v568_v50 = vadd.f32 %v1313_v43, %v567_v46  ;;  %v632_v51 = vadd.f32 %v1313_v43, %v631_v47 }
 0x122   : > { %v1078_v52 = vpack.c.bf16 %v725_v48, %v725_v48  ;;  %v1094_v53 = vpack.c.bf16 %v741_v49, %v741_v49  ;;  %v569_v54 = vpop.f32.mrf.mxu0  ;;  %v633_v55 = vpop.f32.mrf.mxu1 }
 0x123   : > { %vm662_vm9 = vcmp.gt.f32.partialorder %v568_v50, 0.0  ;;  %v694_v56 = vmul.f32 0.2, %v568_v50  ;;  %vm678_vm10 = vcmp.gt.f32.partialorder %v632_v51, 0.0  ;;  %v710_v57 = vmul.f32 0.2, %v632_v51 }
 0x124   : > { %886 = vst.msk [vmem:[%s1321_s19 + $0x28] sm:$0xf] %vm875_vm3, %v1078_v52  ;;  %902 = vst.msk [vmem:[%s1321_s19 + $0x68] sm:$0xf] %vm875_vm3, %v1094_v53  ;;  %v572_v58 = vpop.f32.mrf.mxu0  ;;  %v636_v59 = vpop.f32.mrf.mxu1 }
 0x125   : > { %v726_v60 = vsel %vm662_vm9, %v568_v50, %v694_v56  ;;  %v742_v61 = vsel %vm678_vm10, %v632_v51, %v710_v57  ;;  %v573_v62 = vadd.f32 %v1313_v43, %v572_v58  ;;  %v637_v63 = vadd.f32 %v1313_v43, %v636_v59 }
 0x126   : > { %v1079_v0 = vpack.c.bf16 %v726_v60, %v726_v60  ;;  %v1095_v1 = vpack.c.bf16 %v742_v61, %v742_v61  ;;  %v574_v2 = vpop.f32.mrf.mxu0  ;;  %v638_v3 = vpop.f32.mrf.mxu1 }
 0x127   : > { %vm663_vm11 = vcmp.gt.f32.partialorder %v573_v62, 0.0  ;;  %v695_v4 = vmul.f32 0.2, %v573_v62  ;;  %vm679_vm12 = vcmp.gt.f32.partialorder %v637_v63, 0.0  ;;  %v711_v5 = vmul.f32 0.2, %v637_v63 }
 0x128   : > { %887 = vst.msk [vmem:[%s1321_s19 + $0x2c] sm:$0xf] %vm875_vm3, %v1079_v0  ;;  %903 = vst.msk [vmem:[%s1321_s19 + $0x6c] sm:$0xf] %vm875_vm3, %v1095_v1  ;;  %v575_v6 = vpop.f32.mrf.mxu0  ;;  %v639_v7 = vpop.f32.mrf.mxu1 }
 0x129   : > { %v727_v8 = vsel %vm663_vm11, %v573_v62, %v695_v4  ;;  %v743_v9 = vsel %vm679_vm12, %v637_v63, %v711_v5  ;;  %v576_v10 = vadd.f32 %v1313_v43, %v575_v6  ;;  %v640_v11 = vadd.f32 %v1313_v43, %v639_v7 }
 0x12a   : > { %v1080_v12 = vpack.c.bf16 %v727_v8, %v727_v8  ;;  %v1096_v13 = vpack.c.bf16 %v743_v9, %v743_v9  ;;  %v577_v14 = vpop.f32.mrf.mxu0  ;;  %v641_v15 = vpop.f32.mrf.mxu1 }
 0x12b   : > { %vm664_vm13 = vcmp.gt.f32.partialorder %v576_v10, 0.0  ;;  %v696_v16 = vmul.f32 0.2, %v576_v10  ;;  %vm680_vm14 = vcmp.gt.f32.partialorder %v640_v11, 0.0  ;;  %v712_v17 = vmul.f32 0.2, %v640_v11 }
 0x12c   : > { %888 = vst.msk [vmem:[%s1321_s19 + $0x30] sm:$0xf] %vm875_vm3, %v1080_v12  ;;  %904 = vst.msk [vmem:[%s1321_s19 + $0x70] sm:$0xf] %vm875_vm3, %v1096_v13  ;;  %v580_v18 = vpop.f32.mrf.mxu0  ;;  %v644_v19 = vpop.f32.mrf.mxu1 }
 0x12d   : > { %v728_v20 = vsel %vm664_vm13, %v576_v10, %v696_v16  ;;  %v744_v21 = vsel %vm680_vm14, %v640_v11, %v712_v17  ;;  %v581_v22 = vadd.f32 %v1313_v43, %v580_v18  ;;  %v645_v23 = vadd.f32 %v1313_v43, %v644_v19 }
 0x12e   : > { %v1081_v24 = vpack.c.bf16 %v728_v20, %v728_v20  ;;  %v1097_v25 = vpack.c.bf16 %v744_v21, %v744_v21  ;;  %v582_v26 = vpop.f32.mrf.mxu0  ;;  %v646_v27 = vpop.f32.mrf.mxu1 }
 0x12f   : > { %vm665_vm15 = vcmp.gt.f32.partialorder %v581_v22, 0.0  ;;  %v697_v28 = vmul.f32 0.2, %v581_v22  ;;  %vm681_vm0 = vcmp.gt.f32.partialorder %v645_v23, 0.0  ;;  %v713_v29 = vmul.f32 0.2, %v645_v23 }
 0x130   : > { %889 = vst.msk [vmem:[%s1321_s19 + $0x34] sm:$0xf] %vm875_vm3, %v1081_v24  ;;  %905 = vst.msk [vmem:[%s1321_s19 + $0x74] sm:$0xf] %vm875_vm3, %v1097_v25  ;;  %v583_v30 = vpop.f32.mrf.mxu0  ;;  %v647_v31 = vpop.f32.mrf.mxu1 }
 0x131   : > { %v729_v32 = vsel %vm665_vm15, %v581_v22, %v697_v28  ;;  %v745_v33 = vsel %vm681_vm0, %v645_v23, %v713_v29  ;;  %v584_v34 = vadd.f32 %v1313_v43, %v583_v30  ;;  %v648_v35 = vadd.f32 %v1313_v43, %v647_v31 }
 0x132   : > { %v1082_v36 = vpack.c.bf16 %v729_v32, %v729_v32  ;;  %v1098_v37 = vpack.c.bf16 %v745_v33, %v745_v33  ;;  %v585_v38 = vpop.f32.mrf.mxu0  ;;  %v649_v39 = vpop.f32.mrf.mxu1 }
 0x133   : > { %vm666_vm1 = vcmp.gt.f32.partialorder %v584_v34, 0.0  ;;  %v698_v40 = vmul.f32 0.2, %v584_v34  ;;  %vm682_vm2 = vcmp.gt.f32.partialorder %v648_v35, 0.0  ;;  %v714_v41 = vmul.f32 0.2, %v648_v35 }
 0x134   : > { %890 = vst.msk [vmem:[%s1321_s19 + $0x38] sm:$0xf] %vm875_vm3, %v1082_v36  ;;  %906 = vst.msk [vmem:[%s1321_s19 + $0x78] sm:$0xf] %vm875_vm3, %v1098_v37 }
 0x135   : > { %v730_v42 = vsel %vm666_vm1, %v584_v34, %v698_v40  ;;  %v746_v44 = vsel %vm682_vm2, %v648_v35, %v714_v41 }
 0x136   : > { %v1083_v45 = vpack.c.bf16 %v730_v42, %v730_v42  ;;  %v1099_v46 = vpack.c.bf16 %v746_v44, %v746_v44 }
 0x138   : > { %891 = vst.msk [vmem:[%s1321_s19 + $0x3c] sm:$0xf] %vm875_vm3, %v1083_v45  ;;  %907 = vst.msk [vmem:[%s1321_s19 + $0x7c] sm:$0xf] %vm875_vm3, %v1099_v46 }
 0x139 PF: > { %s13_s12 = sadd.s32 1, %s1193_s12  }
 0x13a   : > { %p10_p4 = scmp.ge.s32.totalorder %s13_s12, 4  }
 0x13c   :  { %12 = sbr.rel (!%p10_p4) target bundleno = 1 (0x1), region = 62 }

// kernel: style_encoder.6
= control target key start
LH: loop header
LB: loop body
LE: loop exit
PB: predicated region body
PF: predicated region fallthrough
CT: control target
= control target key end

     0   :  { %vm455_vm2 = vcmask 257024   ;;  %s862_s1 = inlined_call_operand.vmem [shape: bf16[256,32], index: 1, kind: input, shape index: {}]   ;;  %s863_s0 = inlined_call_operand.vmem [shape: bf16[128,256], index: 0, kind: input, shape index: {}]   ;;  %s864_s2 = inlined_call_operand.vmem [shape: f32[1,32], index: 2, kind: input, shape index: {}]   ;;  %s865_s3 = inlined_call_operand.vmem [shape: bf16[128,32], index: 3, kind: output, shape index: {}]  }
   0x1   :  { %v621_v0 = vld [vmem:[%s862_s1 + $0x78] sm:$0xff]   ;;  %v623_v2 = vld [vmem:[%s862_s1 + $0x70] sm:$0xff]   ;;  %v625_v4 = vld [vmem:[%s862_s1 + $0x68] sm:$0xff]  }
   0x2   :  { %v622_v1 = vld [vmem:[%s862_s1 + $0x38] sm:$0xff]   ;;  %541 = vmatprep.subr.bf16.mxu0 %v621_v0  ;;  %605 = vmatprep.subr.bf16.mxu1 %v621_v0  ;;  %v624_v3 = vld [vmem:[%s862_s1 + $0x30] sm:$0xff]   ;;  %v626_v5 = vld [vmem:[%s862_s1 + $0x28] sm:$0xff]  }
   0x3   :  { %542 = vmatpush3.bf16.msra.mxu0 %v622_v1  ;;  %613 = vmatpush3.bf16.msra.mxu1 %v622_v1  ;;  %v627_v6 = vld [vmem:[%s862_s1 + $0x60] sm:$0xff]   ;;  %v629_v8 = vld [vmem:[%s862_s1 + $0x58] sm:$0xff]   ;;  %v631_v10 = vld [vmem:[%s862_s1 + $0x50] sm:$0xff]  }
   0x4   :  { %543 = vmatprep.subr.bf16.mxu0 %v623_v2  ;;  %606 = vmatprep.subr.bf16.mxu1 %v623_v2  ;;  %v628_v7 = vld [vmem:[%s862_s1 + $0x20] sm:$0xff]   ;;  %v630_v9 = vld [vmem:[%s862_s1 + $0x18] sm:$0xff]   ;;  %v632_v13 = vld [vmem:[%s862_s1 + $0x10] sm:$0xff]  }
   0x5   :  { %v639_v11 = vld [vmem:[%s863_s0 + $0x4] ss:$8 sps:$4 sm:$0xff]   ;;  %v637_v18 = vld [vmem:[%s863_s0] ss:$8 sps:$4 sm:$0xff]   ;;  %v643_v20 = vld [vmem:[%s863_s0 + $0x14] ss:$8 sps:$4 sm:$0xff]  }
   0x6   :  { %v642_v12 = vld [vmem:[%s863_s0 + $0x44] ss:$8 sps:$4 sm:$0xff]   ;;  %278 = vmatprep.mubr.bf16.mxu0 %v639_v11  ;;  %v640_v19 = vld [vmem:[%s863_s0 + $0x40] ss:$8 sps:$4 sm:$0xff]   ;;  %v645_v21 = vld [vmem:[%s863_s0 + $0x54] ss:$8 sps:$4 sm:$0xff]  }
   0x7   :  { %544 = vmatpush3.bf16.msra.mxu0 %v624_v3  ;;  %614 = vmatpush3.bf16.msra.mxu1 %v624_v3  ;;  %v633_v14 = vld [vmem:[%s862_s1 + $0x48] sm:$0xff]   ;;  %v635_v16 = vld [vmem:[%s862_s1 + $0x40] sm:$0xff]   ;;  %v647_v22 = vld [vmem:[%s863_s0 + $0x10] ss:$8 sps:$4 sm:$0xff]  }
   0x8   :  { %545 = vmatprep.subr.bf16.mxu0 %v625_v4  ;;  %607 = vmatprep.subr.bf16.mxu1 %v625_v4  ;;  %v634_v15 = vld [vmem:[%s862_s1 + $0x8] sm:$0xff]   ;;  %v636_v17 = vld [vmem:[%s862_s1] sm:$0xff]   ;;  %v648_v23 = vld [vmem:[%s863_s0 + $0x50] ss:$8 sps:$4 sm:$0xff]  }
   0x9   :  { %310 = vmatprep.mubr.bf16.mxu1 %v642_v12  ;;  %v649_v24 = vld [vmem:[%s863_s0 + $0x24] ss:$8 sps:$4 sm:$0xff]   ;;  %v653_v26 = vld [vmem:[%s863_s0 + $0x20] ss:$8 sps:$4 sm:$0xff]   ;;  %v655_v28 = vld [vmem:[%s863_s0 + $0x34] ss:$8 sps:$4 sm:$0xff]  }
   0xa   :  { %v651_v25 = vld [vmem:[%s863_s0 + $0x64] ss:$8 sps:$4 sm:$0xff]   ;;  %v654_v27 = vld [vmem:[%s863_s0 + $0x60] ss:$8 sps:$4 sm:$0xff]   ;;  %v657_v29 = vld [vmem:[%s863_s0 + $0x74] ss:$8 sps:$4 sm:$0xff]  }
   0xb   :  { %546 = vmatpush3.bf16.msra.mxu0 %v626_v5  ;;  %615 = vmatpush3.bf16.msra.mxu1 %v626_v5  ;;  %v659_v30 = vld [vmem:[%s863_s0 + $0x30] ss:$8 sps:$4 sm:$0xff]   ;;  %v780_v34 = vld [vmem:[%s864_s2] ss:$0 sm:$0xff] }
   0xc   :  { %547 = vmatprep.subr.bf16.mxu0 %v627_v6  ;;  %608 = vmatprep.subr.bf16.mxu1 %v627_v6  ;;  %v660_v31 = vld [vmem:[%s863_s0 + $0x70] ss:$8 sps:$4 sm:$0xff]  }
   0xf   :  { %548 = vmatpush3.bf16.msra.mxu0 %v628_v7  ;;  %616 = vmatpush3.bf16.msra.mxu1 %v628_v7 }
  0x10   :  { %549 = vmatprep.subr.bf16.mxu0 %v629_v8  ;;  %609 = vmatprep.subr.bf16.mxu1 %v629_v8 }
  0x13   :  { %550 = vmatpush3.bf16.msra.mxu0 %v630_v9  ;;  %617 = vmatpush3.bf16.msra.mxu1 %v630_v9 }
  0x14   :  { %551 = vmatprep.subr.bf16.mxu0 %v631_v10  ;;  %610 = vmatprep.subr.bf16.mxu1 %v631_v10 }
  0x17   :  { %552 = vmatpush3.bf16.msra.mxu0 %v632_v13  ;;  %618 = vmatpush3.bf16.msra.mxu1 %v632_v13 }
  0x18   :  { %553 = vmatprep.subr.bf16.mxu0 %v633_v14  ;;  %611 = vmatprep.subr.bf16.mxu1 %v633_v14 }
  0x1b   :  { %554 = vmatpush3.bf16.msra.mxu0 %v634_v15  ;;  %619 = vmatpush3.bf16.msra.mxu1 %v634_v15 }
  0x1c   :  { %555 = vmatprep.subr.bf16.mxu0 %v635_v16  ;;  %612 = vmatprep.subr.bf16.mxu1 %v635_v16 }
  0x1f   :  { %556 = vmatpush3.bf16.msra.mxu0 %v636_v17  ;;  %620 = vmatpush3.bf16.msra.mxu1 %v636_v17 }
  0x22   :  { %279 = vmatmul.mubr.bf16.vlgmr.msra.gmra.mxu0 %v637_v18  ;;  %311 = vmatmul.mubr.bf16.vlgmr.msra.gmra.mxu1 %v640_v19 }
  0x23   :  { %286 = vmatprep.mubr.bf16.mxu0 %v643_v20  ;;  %318 = vmatprep.mubr.bf16.mxu1 %v645_v21 }
  0x2a   :  { %287 = vmatmul.mubr.bf16.gmra.mxu0 %v647_v22  ;;  %319 = vmatmul.mubr.bf16.gmra.mxu1 %v648_v23 }
  0x2b   :  { %294 = vmatprep.mubr.bf16.mxu0 %v649_v24  ;;  %326 = vmatprep.mubr.bf16.mxu1 %v651_v25 }
  0x32   :  { %295 = vmatmul.mubr.bf16.gmra.mxu0 %v653_v26  ;;  %327 = vmatmul.mubr.bf16.gmra.mxu1 %v654_v27 }
  0x33   :  { %302 = vmatprep.mubr.bf16.mxu0 %v655_v28  ;;  %334 = vmatprep.mubr.bf16.mxu1 %v657_v29 }
  0x3a   :  { %303 = vmatmul.mubr.bf16.gmra.mxu0 %v659_v30  ;;  %335 = vmatmul.mubr.bf16.gmra.mxu1 %v660_v31 }
  0xe2   :  { %v557_v32 = vpop.f32.mrf.mxu0  ;;  %v581_v33 = vpop.f32.mrf.mxu1 }
  0xe4   :  { %v558_v35 = vpop.f32.mrf.mxu0  ;;  %v582_v36 = vpop.f32.mrf.mxu1 }
  0xe5   :  { %v559_v37 = vadd.f32 %v558_v35, %v557_v32  ;;  %v583_v38 = vadd.f32 %v582_v36, %v581_v33 }
  0xe6   :  { %v560_v39 = vpop.f32.mrf.mxu0  ;;  %v584_v40 = vpop.f32.mrf.mxu1 }
  0xe7   :  { %v281_v41 = vadd.f32 %v559_v37, %v780_v34  ;;  %v313_v42 = vadd.f32 %v583_v38, %v780_v34 }
  0xe8   :  { %v561_v43 = vpop.f32.mrf.mxu0  ;;  %v585_v44 = vpop.f32.mrf.mxu1 }
  0xe9   :  { %vm343_vm0 = vcmp.gt.f32.partialorder %v281_v41, 0.0  ;;  %v359_v45 = vmul.f32 0.2, %v281_v41  ;;  %vm351_vm1 = vcmp.gt.f32.partialorder %v313_v42, 0.0  ;;  %v367_v46 = vmul.f32 0.2, %v313_v42 }
  0xea   :  { %v562_v47 = vadd.f32 %v561_v43, %v560_v39  ;;  %v586_v48 = vadd.f32 %v585_v44, %v584_v40  ;;  %v563_v49 = vpop.f32.mrf.mxu0  ;;  %v587_v50 = vpop.f32.mrf.mxu1 }
  0xeb   :  { %v375_v51 = vsel %vm343_vm0, %v281_v41, %v359_v45  ;;  %v383_v52 = vsel %vm351_vm1, %v313_v42, %v367_v46 }
  0xec   :  { %v525_v53 = vpack.c.bf16 %v375_v51, %v375_v51  ;;  %v533_v54 = vpack.c.bf16 %v383_v52, %v383_v52  ;;  %v284_v55 = vadd.f32 %v562_v47, %v780_v34  ;;  %v316_v56 = vadd.f32 %v586_v48, %v780_v34  ;;  %v564_v57 = vpop.f32.mrf.mxu0  ;;  %v588_v58 = vpop.f32.mrf.mxu1 }
  0xed   :  { %v565_v59 = vadd.f32 %v564_v57, %v563_v49  ;;  %v589_v60 = vadd.f32 %v588_v58, %v587_v50 }
  0xee   :  { %456 = vst.msk [vmem:[%s865_s3] sm:$0xf] %vm455_vm2, %v525_v53  ;;  %464 = vst.msk [vmem:[%s865_s3 + $0x20] sm:$0xf] %vm455_vm2, %v533_v54  ;;  %vm344_vm3 = vcmp.gt.f32.partialorder %v284_v55, 0.0  ;;  %vm352_vm4 = vcmp.gt.f32.partialorder %v316_v56, 0.0  ;;  %v566_v63 = vpop.f32.mrf.mxu0  ;;  %v590_v0 = vpop.f32.mrf.mxu1 }
  0xef   :  { %v360_v61 = vmul.f32 0.2, %v284_v55  ;;  %v368_v62 = vmul.f32 0.2, %v316_v56  ;;  %v289_v1 = vadd.f32 %v565_v59, %v780_v34  ;;  %v321_v2 = vadd.f32 %v589_v60, %v780_v34 }
  0xf0   :  { %v567_v5 = vpop.f32.mrf.mxu0  ;;  %v591_v6 = vpop.f32.mrf.mxu1 }
  0xf1   :  { %v376_v3 = vsel %vm344_vm3, %v284_v55, %v360_v61  ;;  %v384_v4 = vsel %vm352_vm4, %v316_v56, %v368_v62  ;;  %vm345_vm5 = vcmp.gt.f32.partialorder %v289_v1, 0.0  ;;  %v361_v9 = vmul.f32 0.2, %v289_v1 }
  0xf2   :  { %v526_v7 = vpack.c.bf16 %v376_v3, %v376_v3  ;;  %v534_v8 = vpack.c.bf16 %v384_v4, %v384_v4  ;;  %vm353_vm6 = vcmp.gt.f32.partialorder %v321_v2, 0.0  ;;  %v369_v10 = vmul.f32 0.2, %v321_v2  ;;  %v569_v13 = vpop.f32.mrf.mxu0  ;;  %v593_v14 = vpop.f32.mrf.mxu1 }
  0xf3   :  { %v568_v11 = vadd.f32 %v567_v5, %v566_v63  ;;  %v592_v12 = vadd.f32 %v591_v6, %v590_v0  ;;  %v377_v15 = vsel %vm345_vm5, %v289_v1, %v361_v9 }
  0xf4   :  { %457 = vst.msk [vmem:[%s865_s3 + $0x4] sm:$0xf] %vm455_vm2, %v526_v7  ;;  %465 = vst.msk [vmem:[%s865_s3 + $0x24] sm:$0xf] %vm455_vm2, %v534_v8  ;;  %v527_v16 = vpack.c.bf16 %v377_v15, %v377_v15  ;;  %v385_v17 = vsel %vm353_vm6, %v321_v2, %v369_v10  ;;  %v570_v20 = vpop.f32.mrf.mxu0  ;;  %v594_v21 = vpop.f32.mrf.mxu1 }
  0xf5   :  { %v292_v18 = vadd.f32 %v568_v11, %v780_v34  ;;  %v324_v19 = vadd.f32 %v592_v12, %v780_v34  ;;  %v535_v22 = vpack.c.bf16 %v385_v17, %v385_v17  ;;  %v571_v23 = vadd.f32 %v570_v20, %v569_v13 }
  0xf6   :  { %v595_v24 = vadd.f32 %v594_v21, %v593_v14  ;;  %458 = vst.msk [vmem:[%s865_s3 + $0x8] sm:$0xf] %vm455_vm2, %v527_v16  ;;  %v572_v27 = vpop.f32.mrf.mxu0  ;;  %v596_v28 = vpop.f32.mrf.mxu1 }
  0xf7   :  { %vm346_vm7 = vcmp.gt.f32.partialorder %v292_v18, 0.0  ;;  %v362_v25 = vmul.f32 0.2, %v292_v18  ;;  %vm354_vm8 = vcmp.gt.f32.partialorder %v324_v19, 0.0  ;;  %v370_v26 = vmul.f32 0.2, %v324_v19 }
  0xf8   :  { %466 = vst.msk [vmem:[%s865_s3 + $0x28] sm:$0xf] %vm455_vm2, %v535_v22  ;;  %v297_v29 = vadd.f32 %v571_v23, %v780_v34  ;;  %v329_v30 = vadd.f32 %v595_v24, %v780_v34  ;;  %v573_v33 = vpop.f32.mrf.mxu0  ;;  %v597_v35 = vpop.f32.mrf.mxu1 }
  0xf9   :  { %v378_v31 = vsel %vm346_vm7, %v292_v18, %v362_v25  ;;  %v386_v32 = vsel %vm354_vm8, %v324_v19, %v370_v26  ;;  %v574_v40 = vadd.f32 %v573_v33, %v572_v27  ;;  %v598_v41 = vadd.f32 %v597_v35, %v596_v28 }
  0xfa   :  { %v528_v36 = vpack.c.bf16 %v378_v31, %v378_v31  ;;  %v536_v37 = vpack.c.bf16 %v386_v32, %v386_v32  ;;  %vm347_vm9 = vcmp.gt.f32.partialorder %v297_v29, 0.0  ;;  %v363_v38 = vmul.f32 0.2, %v297_v29  ;;  %v575_v42 = vpop.f32.mrf.mxu0  ;;  %v599_v43 = vpop.f32.mrf.mxu1 }
  0xfb   :  { %vm355_vm10 = vcmp.gt.f32.partialorder %v329_v30, 0.0  ;;  %v371_v39 = vmul.f32 0.2, %v329_v30  ;;  %v300_v47 = vadd.f32 %v574_v40, %v780_v34  ;;  %v332_v48 = vadd.f32 %v598_v41, %v780_v34 }
  0xfc   :  { %459 = vst.msk [vmem:[%s865_s3 + $0xc] sm:$0xf] %vm455_vm2, %v528_v36  ;;  %467 = vst.msk [vmem:[%s865_s3 + $0x2c] sm:$0xf] %vm455_vm2, %v536_v37  ;;  %v379_v44 = vsel %vm347_vm9, %v297_v29, %v363_v38  ;;  %v576_v49 = vpop.f32.mrf.mxu0  ;;  %v600_v50 = vpop.f32.mrf.mxu1 }
  0xfd   :  { %v529_v45 = vpack.c.bf16 %v379_v44, %v379_v44  ;;  %v387_v46 = vsel %vm355_vm10, %v329_v30, %v371_v39  ;;  %v577_v52 = vadd.f32 %v576_v49, %v575_v42  ;;  %v601_v53 = vadd.f32 %v600_v50, %v599_v43 }
  0xfe   :  { %v537_v51 = vpack.c.bf16 %v387_v46, %v387_v46  ;;  %vm348_vm11 = vcmp.gt.f32.partialorder %v300_v47, 0.0  ;;  %v364_v54 = vmul.f32 0.2, %v300_v47  ;;  %vm356_vm12 = vcmp.gt.f32.partialorder %v332_v48, 0.0  ;;  %v578_v56 = vpop.f32.mrf.mxu0  ;;  %v602_v57 = vpop.f32.mrf.mxu1 }
  0xff   :  { %460 = vst.msk [vmem:[%s865_s3 + $0x10] sm:$0xf] %vm455_vm2, %v529_v45  ;;  %v372_v55 = vmul.f32 0.2, %v332_v48  ;;  %v305_v58 = vadd.f32 %v577_v52, %v780_v34  ;;  %v337_v59 = vadd.f32 %v601_v53, %v780_v34 }
 0x100   :  { %468 = vst.msk [vmem:[%s865_s3 + $0x30] sm:$0xf] %vm455_vm2, %v537_v51  ;;  %v380_v60 = vsel %vm348_vm11, %v300_v47, %v364_v54  ;;  %v579_v62 = vpop.f32.mrf.mxu0  ;;  %v603_v63 = vpop.f32.mrf.mxu1 }
 0x101   :  { %v388_v61 = vsel %vm356_vm12, %v332_v48, %v372_v55  ;;  %v530_v0 = vpack.c.bf16 %v380_v60, %v380_v60  ;;  %vm349_vm13 = vcmp.gt.f32.partialorder %v305_v58, 0.0  ;;  %v365_v2 = vmul.f32 0.2, %v305_v58 }
 0x102   :  { %v538_v1 = vpack.c.bf16 %v388_v61, %v388_v61  ;;  %vm357_vm14 = vcmp.gt.f32.partialorder %v337_v59, 0.0  ;;  %v373_v3 = vmul.f32 0.2, %v337_v59  ;;  %v580_v4 = vadd.f32 %v579_v62, %v578_v56 }
 0x103   :  { %v604_v5 = vadd.f32 %v603_v63, %v602_v57  ;;  %461 = vst.msk [vmem:[%s865_s3 + $0x14] sm:$0xf] %vm455_vm2, %v530_v0  ;;  %v381_v6 = vsel %vm349_vm13, %v305_v58, %v365_v2 }
 0x104   :  { %469 = vst.msk [vmem:[%s865_s3 + $0x34] sm:$0xf] %vm455_vm2, %v538_v1  ;;  %v531_v7 = vpack.c.bf16 %v381_v6, %v381_v6  ;;  %v389_v8 = vsel %vm357_vm14, %v337_v59, %v373_v3  ;;  %v308_v9 = vadd.f32 %v580_v4, %v780_v34 }
 0x105   :  { %v340_v10 = vadd.f32 %v604_v5, %v780_v34  ;;  %v539_v11 = vpack.c.bf16 %v389_v8, %v389_v8 }
 0x106   :  { %462 = vst.msk [vmem:[%s865_s3 + $0x18] sm:$0xf] %vm455_vm2, %v531_v7  ;;  %vm350_vm15 = vcmp.gt.f32.partialorder %v308_v9, 0.0  ;;  %v366_v12 = vmul.f32 0.2, %v308_v9 }
 0x107   :  { %vm358_vm0 = vcmp.gt.f32.partialorder %v340_v10, 0.0  ;;  %v374_v13 = vmul.f32 0.2, %v340_v10  ;;  %470 = vst.msk [vmem:[%s865_s3 + $0x38] sm:$0xf] %vm455_vm2, %v539_v11 }
 0x108   :  { %v382_v14 = vsel %vm350_vm15, %v308_v9, %v366_v12 }
 0x109   :  { %v390_v15 = vsel %vm358_vm0, %v340_v10, %v374_v13  ;;  %v532_v16 = vpack.c.bf16 %v382_v14, %v382_v14 }
 0x10a   :  { %v540_v17 = vpack.c.bf16 %v390_v15, %v390_v15 }
 0x10b   :  { %463 = vst.msk [vmem:[%s865_s3 + $0x1c] sm:$0xf] %vm455_vm2, %v532_v16 }
 0x10c   :  { %471 = vst.msk [vmem:[%s865_s3 + $0x3c] sm:$0xf] %vm455_vm2, %v540_v17 }

// kernel: style_encoder.7
= control target key start
LH: loop header
LB: loop body
LE: loop exit
PB: predicated region body
PF: predicated region fallthrough
CT: control target
= control target key end

     0   :  { %vm452_vm1 = vcmask 519168   ;;  %s769_s1 = inlined_call_operand.vmem [shape: bf16[512,64], index: 1, kind: input, shape index: {}]   ;;  %s770_s0 = inlined_call_operand.vmem [shape: bf16[32,512], index: 0, kind: input, shape index: {}]   ;;  %s771_s2 = inlined_call_operand.vmem [shape: f32[1,64], index: 2, kind: input, shape index: {}]   ;;  %s772_s3 = inlined_call_operand.vmem [shape: bf16[32,64], index: 3, kind: output, shape index: {}]  }
   0x1   :  { %v566_v0 = vld [vmem:[%s769_s1 + $0x78] sm:$0xff]   ;;  %v570_v4 = vld [vmem:[%s769_s1 + $0x70] sm:$0xff]   ;;  %v574_v8 = vld [vmem:[%s769_s1 + $0x68] sm:$0xff]  }
   0x2   :  { %v567_v1 = vld [vmem:[%s769_s1 + $0xf8] sm:$0xff]   ;;  %510 = vmatprep.subr.bf16.mxu0 %v566_v0  ;;  %v571_v5 = vld [vmem:[%s769_s1 + $0xf0] sm:$0xff]   ;;  %v575_v9 = vld [vmem:[%s769_s1 + $0xe8] sm:$0xff]  }
   0x3   :  { %v568_v2 = vld [vmem:[%s769_s1 + $0x38] sm:$0xff]   ;;  %538 = vmatprep.subr.bf16.mxu1 %v567_v1  ;;  %v572_v6 = vld [vmem:[%s769_s1 + $0x30] sm:$0xff]   ;;  %v576_v10 = vld [vmem:[%s769_s1 + $0x28] sm:$0xff]  }
   0x4   :  { %v569_v3 = vld [vmem:[%s769_s1 + $0xb8] sm:$0xff]   ;;  %511 = vmatpush3.bf16.msra.mxu0 %v568_v2  ;;  %v573_v7 = vld [vmem:[%s769_s1 + $0xb0] sm:$0xff]   ;;  %v577_v11 = vld [vmem:[%s769_s1 + $0xa8] sm:$0xff]  }
   0x5   :  { %539 = vmatpush3.bf16.msra.mxu1 %v569_v3  ;;  %512 = vmatprep.subr.bf16.mxu0 %v570_v4  ;;  %v578_v12 = vld [vmem:[%s769_s1 + $0x60] sm:$0xff]   ;;  %v582_v16 = vld [vmem:[%s769_s1 + $0x58] sm:$0xff]   ;;  %v586_v20 = vld [vmem:[%s769_s1 + $0x50] sm:$0xff]  }
   0x6   :  { %540 = vmatprep.subr.bf16.mxu1 %v571_v5  ;;  %v579_v13 = vld [vmem:[%s769_s1 + $0xe0] sm:$0xff]   ;;  %v583_v17 = vld [vmem:[%s769_s1 + $0xd8] sm:$0xff]   ;;  %v587_v21 = vld [vmem:[%s769_s1 + $0xd0] sm:$0xff]  }
   0x7   :  { %v580_v14 = vld [vmem:[%s769_s1 + $0x20] sm:$0xff]   ;;  %v584_v18 = vld [vmem:[%s769_s1 + $0x18] sm:$0xff]   ;;  %v588_v22 = vld [vmem:[%s769_s1 + $0x10] sm:$0xff]  }
   0x8   :  { %513 = vmatpush3.bf16.msra.mxu0 %v572_v6  ;;  %v581_v15 = vld [vmem:[%s769_s1 + $0xa0] sm:$0xff]   ;;  %v585_v19 = vld [vmem:[%s769_s1 + $0x98] sm:$0xff]   ;;  %v589_v23 = vld [vmem:[%s769_s1 + $0x90] sm:$0xff]  }
   0x9   :  { %541 = vmatpush3.bf16.msra.mxu1 %v573_v7  ;;  %514 = vmatprep.subr.bf16.mxu0 %v574_v8  ;;  %v590_v24 = vld [vmem:[%s769_s1 + $0x48] sm:$0xff]   ;;  %v594_v28 = vld [vmem:[%s769_s1 + $0x40] sm:$0xff]  }
   0xa   :  { %542 = vmatprep.subr.bf16.mxu1 %v575_v9  ;;  %v591_v25 = vld [vmem:[%s769_s1 + $0xc8] sm:$0xff]   ;;  %v595_v29 = vld [vmem:[%s769_s1 + $0xc0] sm:$0xff]  }
   0xb   :  { %v592_v26 = vld [vmem:[%s769_s1 + $0x8] sm:$0xff]   ;;  %v596_v30 = vld [vmem:[%s769_s1] sm:$0xff]  }
   0xc   :  { %515 = vmatpush3.bf16.msra.mxu0 %v576_v10  ;;  %v593_v27 = vld [vmem:[%s769_s1 + $0x88] sm:$0xff]   ;;  %v597_v31 = vld [vmem:[%s769_s1 + $0x80] sm:$0xff]  }
   0xd   :  { %543 = vmatpush3.bf16.msra.mxu1 %v577_v11  ;;  %516 = vmatprep.subr.bf16.mxu0 %v578_v12  ;;  %v598_v32 = vld [vmem:[%s770_s0] ss:$16 sps:$4 sm:$0xff]   ;;  %v600_v33 = vld [vmem:[%s770_s0 + $0x4] ss:$16 sps:$4 sm:$0xff]   ;;  %v601_v34 = vld [vmem:[%s770_s0 + $0x8] ss:$16 sps:$4 sm:$0xff]  }
   0xe   :  { %544 = vmatprep.subr.bf16.mxu1 %v579_v13  ;;  %v603_v35 = vld [vmem:[%s770_s0 + $0xc] ss:$16 sps:$4 sm:$0xff]   ;;  %358 = vmatprep.mubr.bf16.mxu0 %v600_v33  ;;  %v604_v36 = vld [vmem:[%s770_s0 + $0x24] ss:$16 sps:$4 sm:$0xff]   ;;  %v608_v38 = vld [vmem:[%s770_s0 + $0x20] ss:$16 sps:$4 sm:$0xff]  }
   0xf   :  { %407 = vmatprep.mubr.bf16.mxu1 %v603_v35  ;;  %v606_v37 = vld [vmem:[%s770_s0 + $0x2c] ss:$16 sps:$4 sm:$0xff]   ;;  %v609_v39 = vld [vmem:[%s770_s0 + $0x28] ss:$16 sps:$4 sm:$0xff]   ;;  %v461_v42 = vld [vmem:[%s771_s2] ss:$0 sm:$0xff] }
  0x10   :  { %517 = vmatpush3.bf16.msra.mxu0 %v580_v14 }
  0x11   :  { %545 = vmatpush3.bf16.msra.mxu1 %v581_v15  ;;  %518 = vmatprep.subr.bf16.mxu0 %v582_v16 }
  0x12   :  { %546 = vmatprep.subr.bf16.mxu1 %v583_v17 }
  0x14   :  { %519 = vmatpush3.bf16.msra.mxu0 %v584_v18 }
  0x15   :  { %547 = vmatpush3.bf16.msra.mxu1 %v585_v19  ;;  %520 = vmatprep.subr.bf16.mxu0 %v586_v20 }
  0x16   :  { %548 = vmatprep.subr.bf16.mxu1 %v587_v21 }
  0x18   :  { %521 = vmatpush3.bf16.msra.mxu0 %v588_v22 }
  0x19   :  { %549 = vmatpush3.bf16.msra.mxu1 %v589_v23  ;;  %522 = vmatprep.subr.bf16.mxu0 %v590_v24 }
  0x1a   :  { %550 = vmatprep.subr.bf16.mxu1 %v591_v25 }
  0x1c   :  { %523 = vmatpush3.bf16.msra.mxu0 %v592_v26 }
  0x1d   :  { %551 = vmatpush3.bf16.msra.mxu1 %v593_v27  ;;  %524 = vmatprep.subr.bf16.mxu0 %v594_v28 }
  0x1e   :  { %552 = vmatprep.subr.bf16.mxu1 %v595_v29 }
  0x20   :  { %525 = vmatpush3.bf16.msra.mxu0 %v596_v30 }
  0x21   :  { %553 = vmatpush3.bf16.msra.mxu1 %v597_v31 }
  0x23   :  { %359 = vmatmul.mubr.bf16.vlgmr.msra.gmra.mxu0 %v598_v32 }
  0x24   :  { %408 = vmatmul.mubr.bf16.vlgmr.msra.gmra.mxu1 %v601_v34  ;;  %366 = vmatprep.mubr.bf16.mxu0 %v604_v36 }
  0x25   :  { %415 = vmatprep.mubr.bf16.mxu1 %v606_v37 }
  0x2b   :  { %367 = vmatmul.mubr.bf16.gmra.mxu0 %v608_v38 }
  0x2c   :  { %416 = vmatmul.mubr.bf16.gmra.mxu1 %v609_v39 }
  0xe3   :  { %v526_v40 = vpop.f32.mrf.mxu0 }
  0xe4   :  { %v554_v41 = vpop.f32.mrf.mxu1 }
  0xe5   :  { %v527_v43 = vpop.f32.mrf.mxu0 }
  0xe6   :  { %v528_v44 = vadd.f32 %v527_v43, %v526_v40  ;;  %v555_v45 = vpop.f32.mrf.mxu1 }
  0xe7   :  { %v529_v46 = vpop.f32.mrf.mxu0  ;;  %v556_v48 = vadd.f32 %v555_v45, %v554_v41 }
  0xe8   :  { %v361_v47 = vadd.f32 %v528_v44, %v461_v42  ;;  %v557_v49 = vpop.f32.mrf.mxu1 }
  0xe9   :  { %v530_v50 = vpop.f32.mrf.mxu0 }
  0xea   :  { %v410_v51 = vadd.f32 %v556_v48, %v361_v47  ;;  %v531_v52 = vadd.f32 %v530_v50, %v529_v46  ;;  %v558_v53 = vpop.f32.mrf.mxu1 }
  0xeb   :  { %v532_v54 = vpop.f32.mrf.mxu0  ;;  %v559_v57 = vadd.f32 %v558_v53, %v557_v49 }
  0xec   :  { %vm424_vm0 = vcmp.gt.f32.partialorder %v410_v51, 0.0  ;;  %v428_v55 = vmul.f32 0.2, %v410_v51  ;;  %v364_v56 = vadd.f32 %v531_v52, %v461_v42  ;;  %v560_v58 = vpop.f32.mrf.mxu1 }
  0xed   :  { %v533_v59 = vpop.f32.mrf.mxu0 }
  0xee   :  { %v432_v60 = vsel %vm424_vm0, %v410_v51, %v428_v55  ;;  %v413_v61 = vadd.f32 %v559_v57, %v364_v56  ;;  %v534_v62 = vadd.f32 %v533_v59, %v532_v54  ;;  %v561_v63 = vpop.f32.mrf.mxu1 }
  0xef   :  { %v506_v0 = vpack.c.bf16 %v432_v60, %v432_v60  ;;  %v535_v1 = vpop.f32.mrf.mxu0  ;;  %v562_v4 = vadd.f32 %v561_v63, %v560_v58 }
  0xf0   :  { %vm425_vm2 = vcmp.gt.f32.partialorder %v413_v61, 0.0  ;;  %v429_v2 = vmul.f32 0.2, %v413_v61  ;;  %v369_v3 = vadd.f32 %v534_v62, %v461_v42  ;;  %v563_v5 = vpop.f32.mrf.mxu1 }
  0xf1   :  { %453 = vst.msk [vmem:[%s772_s3] sm:$0xf] %vm452_vm1, %v506_v0  ;;  %v536_v6 = vpop.f32.mrf.mxu0 }
  0xf2   :  { %v433_v7 = vsel %vm425_vm2, %v413_v61, %v429_v2  ;;  %v418_v8 = vadd.f32 %v562_v4, %v369_v3  ;;  %v537_v9 = vadd.f32 %v536_v6, %v535_v1  ;;  %v564_v10 = vpop.f32.mrf.mxu1 }
  0xf3   :  { %v507_v11 = vpack.c.bf16 %v433_v7, %v433_v7  ;;  %v565_v14 = vadd.f32 %v564_v10, %v563_v5 }
  0xf4   :  { %vm426_vm3 = vcmp.gt.f32.partialorder %v418_v8, 0.0  ;;  %v430_v12 = vmul.f32 0.2, %v418_v8  ;;  %v372_v13 = vadd.f32 %v537_v9, %v461_v42 }
  0xf5   :  { %454 = vst.msk [vmem:[%s772_s3 + $0x4] sm:$0xf] %vm452_vm1, %v507_v11 }
  0xf6   :  { %v434_v15 = vsel %vm426_vm3, %v418_v8, %v430_v12  ;;  %v421_v16 = vadd.f32 %v565_v14, %v372_v13 }
  0xf7   :  { %v508_v17 = vpack.c.bf16 %v434_v15, %v434_v15 }
  0xf8   :  { %vm427_vm4 = vcmp.gt.f32.partialorder %v421_v16, 0.0  ;;  %v431_v18 = vmul.f32 0.2, %v421_v16 }
  0xf9   :  { %455 = vst.msk [vmem:[%s772_s3 + $0x8] sm:$0xf] %vm452_vm1, %v508_v17 }
  0xfa   :  { %v435_v19 = vsel %vm427_vm4, %v421_v16, %v431_v18 }
  0xfb   :  { %v509_v20 = vpack.c.bf16 %v435_v19, %v435_v19 }
  0xfd   :  { %456 = vst.msk [vmem:[%s772_s3 + $0xc] sm:$0xf] %vm452_vm1, %v509_v20 }

// kernel: style_encoder.8
= control target key start
LH: loop header
LB: loop body
LE: loop exit
PB: predicated region body
PF: predicated region fallthrough
CT: control target
= control target key end

     0   :  { %vm730_vm1 = vcmask 519168   ;;  %s1199_s1 = inlined_call_operand.vmem [shape: bf16[1024,64], index: 1, kind: input, shape index: {}]   ;;  %s1200_s0 = inlined_call_operand.vmem [shape: bf16[8,1024], index: 0, kind: input, shape index: {}]   ;;  %s1201_s2 = inlined_call_operand.vmem [shape: f32[1,64], index: 2, kind: input, shape index: {}]   ;;  %s1202_s3 = inlined_call_operand.vmem [shape: bf16[8,64], index: 3, kind: output, shape index: {}]  }
   0x1   :  { %v897_v0 = vld [vmem:[%s1199_s1 + $0x78] sm:$0xff]   ;;  %v901_v4 = vld [vmem:[%s1199_s1 + $0x70] sm:$0xff]   ;;  %v905_v8 = vld [vmem:[%s1199_s1 + $0x68] sm:$0xff]  }
   0x2   :  { %v898_v1 = vld [vmem:[%s1199_s1 + $0xf8] sm:$0xff]   ;;  %809 = vmatprep.subr.bf16.mxu0 %v897_v0  ;;  %v902_v5 = vld [vmem:[%s1199_s1 + $0xf0] sm:$0xff]   ;;  %v906_v9 = vld [vmem:[%s1199_s1 + $0xe8] sm:$0xff]  }
   0x3   :  { %v899_v2 = vld [vmem:[%s1199_s1 + $0x38] sm:$0xff]   ;;  %831 = vmatprep.subr.bf16.mxu1 %v898_v1  ;;  %v903_v6 = vld [vmem:[%s1199_s1 + $0x30] sm:$0xff]   ;;  %v907_v10 = vld [vmem:[%s1199_s1 + $0x28] sm:$0xff]  }
   0x4   :  { %v900_v3 = vld [vmem:[%s1199_s1 + $0xb8] sm:$0xff]   ;;  %810 = vmatpush3.bf16.msra.mxu0 %v899_v2  ;;  %v904_v7 = vld [vmem:[%s1199_s1 + $0xb0] sm:$0xff]   ;;  %v908_v11 = vld [vmem:[%s1199_s1 + $0xa8] sm:$0xff]  }
   0x5   :  { %832 = vmatpush3.bf16.msra.mxu1 %v900_v3  ;;  %811 = vmatprep.subr.bf16.mxu0 %v901_v4  ;;  %v909_v12 = vld [vmem:[%s1199_s1 + $0x60] sm:$0xff]   ;;  %v913_v16 = vld [vmem:[%s1199_s1 + $0x58] sm:$0xff]   ;;  %v917_v20 = vld [vmem:[%s1199_s1 + $0x50] sm:$0xff]  }
   0x6   :  { %833 = vmatprep.subr.bf16.mxu1 %v902_v5  ;;  %v910_v13 = vld [vmem:[%s1199_s1 + $0xe0] sm:$0xff]   ;;  %v914_v17 = vld [vmem:[%s1199_s1 + $0xd8] sm:$0xff]   ;;  %v918_v21 = vld [vmem:[%s1199_s1 + $0xd0] sm:$0xff]  }
   0x7   :  { %v911_v14 = vld [vmem:[%s1199_s1 + $0x20] sm:$0xff]   ;;  %v915_v18 = vld [vmem:[%s1199_s1 + $0x18] sm:$0xff]   ;;  %v919_v22 = vld [vmem:[%s1199_s1 + $0x10] sm:$0xff]  }
   0x8   :  { %812 = vmatpush3.bf16.msra.mxu0 %v903_v6  ;;  %v912_v15 = vld [vmem:[%s1199_s1 + $0xa0] sm:$0xff]   ;;  %v916_v19 = vld [vmem:[%s1199_s1 + $0x98] sm:$0xff]   ;;  %v920_v23 = vld [vmem:[%s1199_s1 + $0x90] sm:$0xff]  }
   0x9   :  { %834 = vmatpush3.bf16.msra.mxu1 %v904_v7  ;;  %813 = vmatprep.subr.bf16.mxu0 %v905_v8  ;;  %v921_v24 = vld [vmem:[%s1199_s1 + $0x48] sm:$0xff]   ;;  %v925_v28 = vld [vmem:[%s1199_s1 + $0x40] sm:$0xff]   ;;  %v933_v38 = vld [vmem:[%s1199_s1 + $0x178] sm:$0xff]  }
   0xa   :  { %835 = vmatprep.subr.bf16.mxu1 %v906_v9  ;;  %v922_v25 = vld [vmem:[%s1199_s1 + $0xc8] sm:$0xff]   ;;  %v926_v29 = vld [vmem:[%s1199_s1 + $0xc0] sm:$0xff]   ;;  %v934_v39 = vld [vmem:[%s1199_s1 + $0x1f8] sm:$0xff]  }
   0xb   :  { %v923_v26 = vld [vmem:[%s1199_s1 + $0x8] sm:$0xff]   ;;  %v927_v30 = vld [vmem:[%s1199_s1] sm:$0xff]   ;;  %v935_v40 = vld [vmem:[%s1199_s1 + $0x138] sm:$0xff]  }
   0xc   :  { %814 = vmatpush3.bf16.msra.mxu0 %v907_v10  ;;  %v924_v27 = vld [vmem:[%s1199_s1 + $0x88] sm:$0xff]   ;;  %v928_v31 = vld [vmem:[%s1199_s1 + $0x80] sm:$0xff]   ;;  %v936_v41 = vld [vmem:[%s1199_s1 + $0x1b8] sm:$0xff]  }
   0xd   :  { %836 = vmatpush3.bf16.msra.mxu1 %v908_v11  ;;  %815 = vmatprep.subr.bf16.mxu0 %v909_v12  ;;  %v15_v32 = vld [vmem:[%s1200_s0] sm:$0xff]  ;;  %v16_v33 = vld [vmem:[%s1200_s0 + $0x8] sm:$0xff]  ;;  %v937_v42 = vld [vmem:[%s1199_s1 + $0x170] sm:$0xff]  }
   0xe   :  { %837 = vmatprep.subr.bf16.mxu1 %v910_v13  ;;  %v737_v34 = vcombine.low %v15_v32, %v15_v32  ;;  %v738_v35 = vcombine.high %v15_v32, %v15_v32  ;;  %v739_v36 = vcombine.low %v16_v33, %v16_v33  ;;  %v740_v37 = vcombine.high %v16_v33, %v16_v33  ;;  %v938_v43 = vld [vmem:[%s1199_s1 + $0x1f0] sm:$0xff]   ;;  %v941_v46 = vld [vmem:[%s1199_s1 + $0x168] sm:$0xff]   ;;  %v945_v50 = vld [vmem:[%s1199_s1 + $0x160] sm:$0xff]  }
   0xf   :  { %v939_v44 = vld [vmem:[%s1199_s1 + $0x130] sm:$0xff]   ;;  %v942_v47 = vld [vmem:[%s1199_s1 + $0x1e8] sm:$0xff]   ;;  %v946_v51 = vld [vmem:[%s1199_s1 + $0x1e0] sm:$0xff]  }
  0x10   :  { %816 = vmatpush3.bf16.msra.mxu0 %v911_v14  ;;  %598 = vmatprep.mubr.bf16.mxu0 %v738_v35  ;;  %v940_v45 = vld [vmem:[%s1199_s1 + $0x1b0] sm:$0xff]   ;;  %v943_v48 = vld [vmem:[%s1199_s1 + $0x128] sm:$0xff]   ;;  %v947_v52 = vld [vmem:[%s1199_s1 + $0x120] sm:$0xff]  }
  0x11   :  { %838 = vmatpush3.bf16.msra.mxu1 %v912_v15  ;;  %817 = vmatprep.subr.bf16.mxu0 %v913_v16  ;;  %v944_v49 = vld [vmem:[%s1199_s1 + $0x1a8] sm:$0xff]   ;;  %v948_v53 = vld [vmem:[%s1199_s1 + $0x1a0] sm:$0xff]   ;;  %v949_v54 = vld [vmem:[%s1199_s1 + $0x158] sm:$0xff]  }
  0x12   :  { %839 = vmatprep.subr.bf16.mxu1 %v914_v17  ;;  %638 = vmatprep.mubr.bf16.mxu1 %v740_v37  ;;  %v950_v55 = vld [vmem:[%s1199_s1 + $0x1d8] sm:$0xff]   ;;  %v953_v58 = vld [vmem:[%s1199_s1 + $0x150] sm:$0xff]   ;;  %v957_v62 = vld [vmem:[%s1199_s1 + $0x148] sm:$0xff]  }
  0x13   :  { %v951_v56 = vld [vmem:[%s1199_s1 + $0x118] sm:$0xff]   ;;  %v954_v59 = vld [vmem:[%s1199_s1 + $0x1d0] sm:$0xff]   ;;  %v958_v63 = vld [vmem:[%s1199_s1 + $0x1c8] sm:$0xff]  }
  0x14   :  { %818 = vmatpush3.bf16.msra.mxu0 %v915_v18  ;;  %v952_v57 = vld [vmem:[%s1199_s1 + $0x198] sm:$0xff]   ;;  %v955_v60 = vld [vmem:[%s1199_s1 + $0x110] sm:$0xff]   ;;  %v959_v0 = vld [vmem:[%s1199_s1 + $0x108] sm:$0xff]  }
  0x15   :  { %840 = vmatpush3.bf16.msra.mxu1 %v916_v19  ;;  %819 = vmatprep.subr.bf16.mxu0 %v917_v20  ;;  %v956_v61 = vld [vmem:[%s1199_s1 + $0x190] sm:$0xff]   ;;  %v960_v1 = vld [vmem:[%s1199_s1 + $0x188] sm:$0xff]   ;;  %v961_v2 = vld [vmem:[%s1199_s1 + $0x140] sm:$0xff]  }
  0x16   :  { %841 = vmatprep.subr.bf16.mxu1 %v918_v21  ;;  %v962_v3 = vld [vmem:[%s1199_s1 + $0x1c0] sm:$0xff]   ;;  %v17_v6 = vld [vmem:[%s1200_s0 + $0x10] sm:$0xff]  ;;  %v18_v9 = vld [vmem:[%s1200_s0 + $0x18] sm:$0xff] }
  0x17   :  { %v963_v4 = vld [vmem:[%s1199_s1 + $0x100] sm:$0xff]   ;;  %v741_v7 = vcombine.low %v17_v6, %v17_v6  ;;  %v742_v8 = vcombine.high %v17_v6, %v17_v6  ;;  %v743_v10 = vcombine.low %v18_v9, %v18_v9  ;;  %v744_v11 = vcombine.high %v18_v9, %v18_v9 }
  0x18   :  { %820 = vmatpush3.bf16.msra.mxu0 %v919_v22  ;;  %v964_v5 = vld [vmem:[%s1199_s1 + $0x180] sm:$0xff]  }
  0x19   :  { %842 = vmatpush3.bf16.msra.mxu1 %v920_v23  ;;  %821 = vmatprep.subr.bf16.mxu0 %v921_v24  ;;  %v736_v21 = vld [vmem:[%s1201_s2] ss:$0 sm:$0xff] }
  0x1a   :  { %843 = vmatprep.subr.bf16.mxu1 %v922_v25 }
  0x1c   :  { %822 = vmatpush3.bf16.msra.mxu0 %v923_v26 }
  0x1d   :  { %844 = vmatpush3.bf16.msra.mxu1 %v924_v27  ;;  %823 = vmatprep.subr.bf16.mxu0 %v925_v28 }
  0x1e   :  { %845 = vmatprep.subr.bf16.mxu1 %v926_v29 }
  0x20   :  { %824 = vmatpush3.bf16.msra.mxu0 %v927_v30 }
  0x21   :  { %846 = vmatpush3.bf16.msra.mxu1 %v928_v31  ;;  %853 = vmatprep.subr.bf16.mxu0 %v933_v38 }
  0x22   :  { %875 = vmatprep.subr.bf16.mxu1 %v934_v39 }
  0x23   :  { %599 = vmatmul.mubr.bf16.vlgmr.msra.gmra.mxu0 %v737_v34 }
  0x24   :  { %639 = vmatmul.mubr.bf16.vlgmr.msra.gmra.mxu1 %v739_v36  ;;  %854 = vmatpush3.bf16.msra.mxu0 %v935_v40 }
  0x25   :  { %876 = vmatpush3.bf16.msra.mxu1 %v936_v41  ;;  %855 = vmatprep.subr.bf16.mxu0 %v937_v42 }
  0x26   :  { %877 = vmatprep.subr.bf16.mxu1 %v938_v43  ;;  %678 = vmatprep.mubr.bf16.mxu0 %v742_v8 }
  0x27   :  { %718 = vmatprep.mubr.bf16.mxu1 %v744_v11 }
  0x28   :  { %856 = vmatpush3.bf16.msra.mxu0 %v939_v44 }
  0x29   :  { %878 = vmatpush3.bf16.msra.mxu1 %v940_v45  ;;  %857 = vmatprep.subr.bf16.mxu0 %v941_v46 }
  0x2a   :  { %879 = vmatprep.subr.bf16.mxu1 %v942_v47 }
  0x2c   :  { %858 = vmatpush3.bf16.msra.mxu0 %v943_v48 }
  0x2d   :  { %880 = vmatpush3.bf16.msra.mxu1 %v944_v49  ;;  %859 = vmatprep.subr.bf16.mxu0 %v945_v50 }
  0x2e   :  { %881 = vmatprep.subr.bf16.mxu1 %v946_v51 }
  0x30   :  { %860 = vmatpush3.bf16.msra.mxu0 %v947_v52 }
  0x31   :  { %882 = vmatpush3.bf16.msra.mxu1 %v948_v53  ;;  %861 = vmatprep.subr.bf16.mxu0 %v949_v54 }
  0x32   :  { %883 = vmatprep.subr.bf16.mxu1 %v950_v55 }
  0x34   :  { %862 = vmatpush3.bf16.msra.mxu0 %v951_v56 }
  0x35   :  { %884 = vmatpush3.bf16.msra.mxu1 %v952_v57  ;;  %863 = vmatprep.subr.bf16.mxu0 %v953_v58 }
  0x36   :  { %885 = vmatprep.subr.bf16.mxu1 %v954_v59 }
  0x38   :  { %864 = vmatpush3.bf16.msra.mxu0 %v955_v60 }
  0x39   :  { %886 = vmatpush3.bf16.msra.mxu1 %v956_v61  ;;  %865 = vmatprep.subr.bf16.mxu0 %v957_v62 }
  0x3a   :  { %887 = vmatprep.subr.bf16.mxu1 %v958_v63 }
  0x3c   :  { %866 = vmatpush3.bf16.msra.mxu0 %v959_v0 }
  0x3d   :  { %888 = vmatpush3.bf16.msra.mxu1 %v960_v1  ;;  %867 = vmatprep.subr.bf16.mxu0 %v961_v2 }
  0x3e   :  { %889 = vmatprep.subr.bf16.mxu1 %v962_v3 }
  0x40   :  { %868 = vmatpush3.bf16.msra.mxu0 %v963_v4 }
  0x41   :  { %890 = vmatpush3.bf16.msra.mxu1 %v964_v5 }
  0x43   :  { %679 = vmatmul.mubr.bf16.vlgmr.msra.gmra.mxu0 %v741_v7 }
  0x44   :  { %719 = vmatmul.mubr.bf16.vlgmr.msra.gmra.mxu1 %v743_v10 }
  0xe3   :  { %v825_v12 = vpop.f32.mrf.mxu0 }
  0xe4   :  { %v847_v13 = vpop.f32.mrf.mxu1 }
  0xe5   :  { %v826_v14 = vpop.f32.mrf.mxu0 }
  0xe6   :  { %v848_v15 = vpop.f32.mrf.mxu1  ;;  %v827_v20 = vadd.f32 %v826_v14, %v825_v12 }
  0xe7   :  { %v828_v16 = vpop.f32.mrf.mxu0  ;;  %v849_v23 = vadd.f32 %v848_v15, %v847_v13 }
  0xe8   :  { %v850_v17 = vpop.f32.mrf.mxu1  ;;  %v601_v22 = vadd.f32 %v827_v20, %v736_v21 }
  0xe9   :  { %v829_v18 = vpop.f32.mrf.mxu0 }
  0xea   :  { %v851_v19 = vpop.f32.mrf.mxu1  ;;  %v641_v28 = vadd.f32 %v849_v23, %v601_v22 }
 0x103   :  { %v869_v24 = vpop.f32.mrf.mxu0 }
 0x104   :  { %v891_v25 = vpop.f32.mrf.mxu1 }
 0x105   :  { %v870_v26 = vpop.f32.mrf.mxu0 }
 0x106   :  { %v892_v27 = vpop.f32.mrf.mxu1  ;;  %v871_v29 = vadd.f32 %v870_v26, %v869_v24 }
 0x107   :  { %v872_v30 = vpop.f32.mrf.mxu0  ;;  %v893_v33 = vadd.f32 %v892_v27, %v891_v25 }
 0x108   :  { %v894_v31 = vpop.f32.mrf.mxu1  ;;  %v681_v32 = vadd.f32 %v871_v29, %v641_v28 }
 0x109   :  { %v873_v34 = vpop.f32.mrf.mxu0 }
 0x10a   :  { %v895_v35 = vpop.f32.mrf.mxu1  ;;  %v721_v36 = vadd.f32 %v893_v33, %v681_v32 }
 0x10c   :  { %vm726_vm0 = vcmp.gt.f32.partialorder %v721_v36, 0.0  ;;  %v727_v37 = vmul.f32 0.2, %v721_v36 }
 0x10e   :  { %v728_v38 = vsel %vm726_vm0, %v721_v36, %v727_v37 }
 0x10f   :  { %v729_v39 = vpack.c.bf16 %v728_v38, %v728_v38 }
 0x111   :  { %731 = vst.msk [vmem:[%s1202_s3] sm:$0xf] %vm730_vm1, %v729_v39 }

// kernel: style_encoder.9
= control target key start
LH: loop header
LB: loop body
LE: loop exit
PB: predicated region body
PF: predicated region fallthrough
CT: control target
= control target key end

     0   :  { %v198_v1 = vmov 0.0   ;;  %vm199_vm0 = vmmov 0   ;;  %vm19_vm1 = vcmask 519168   ;;  %s257_s0 = inlined_call_operand.vmem [shape: bf16[2,4,64], index: 0, kind: input, shape index: {}]   ;;  %s258_s1 = inlined_call_operand.vmem [shape: f32[64,128], index: 1, kind: input, shape index: {}]   ;;  %s259_s2 = inlined_call_operand.vmem [shape: f32[1,128], index: 2, kind: input, shape index: {}]   ;;  %s260_s3 = inlined_call_operand.hbm [shape: f32[2,128], index: 3, kind: output, shape index: {}]  }
   0x1   :  { %v43_v0 = vld [vmem:[%s258_s1 + $0x38] sm:$0xff]  ;;  %154 = vmatprep.subr.mxu0 %v198_v1  ;;  %v42_v2 = vld [vmem:[%s258_s1 + $0x30] sm:$0xff]  ;;  %170 = vmatprep.mubr.msk.f32.mxu0 %vm199_vm0, %v198_v1  ;;  %v15_v3 = vld [vmem:[%s257_s0] sm:$0x3] }
   0x2   :  { %155 = vmatpush3.msra.mxu0 %v43_v0  ;;  %v41_v4 = vld [vmem:[%s258_s1 + $0x28] sm:$0xff]  ;;  %v16_v5 = vld [vmem:[%s257_s0 + $0x2] sm:$0x3]  ;;  %v17_v6 = vunpack.c.l.bf16 %v15_v3 }
   0x3   :  { %156 = vmatprep.subr.mxu0 %v198_v1 }
   0x4   :  { %8 = vsyncpa [#allocation3], 0  ;;  %157 = vmatpush3.msra.mxu0 %v42_v2  ;;  %v18_v7 = vunpack.c.l.bf16 %v16_v5  ;;  %v40_v8 = vld [vmem:[%s258_s1 + $0x20] sm:$0xff]  ;;  %v20_v9 = vsel %vm19_vm1, %v17_v6, 0.0  ;;  %v39_v12 = vld [vmem:[%s258_s1 + $0x18] sm:$0xff]  ;;  %vm53_vm2 = vcmask 1041409  }
   0x5   :  { %158 = vmatprep.subr.mxu0 %v198_v1  ;;  %v21_v10 = vrot.slane %v20_v9, 4  ;;  %v38_v15 = vld [vmem:[%s258_s1 + $0x10] sm:$0xff]  ;;  %v37_v18 = vld [vmem:[%s258_s1 + $0x8] sm:$0xff]  ;;  %v36_v21 = vld [vmem:[%s258_s1] sm:$0xff]  ;;  %vm55_vm3 = vcmask 523264   ;;  %s200_s6 = smov [#allocation2]  }
   0x6   :  { %159 = vmatpush3.msra.mxu0 %v41_v4  ;;  %v27_v11 = vsel %vm19_vm1, %v18_v7, 0.0  ;;  %v143_v30 = vld [vmem:[%s259_s2] ss:$0 sm:$0xff]  ;;  %s135_s1 = sshll.u32 %s200_s6, 4  ;;  %s136_s1 = int_to_ptr.vmem [resolvable:$true] %s135_s1 }
   0x7   :  { %160 = vmatprep.subr.mxu0 %v198_v1  ;;  %v28_v13 = vrot.slane %v27_v11, 4  ;;  %v22_v14 = vadd.f32 %v21_v10, %v20_v9  ;;  %s176_s7 = scalar_lea.vmem %s136_s1, 32  ;;  %p181_p1 = scmp.lt.s32.totalorder %s136_s1, %s136_s1 }
   0x8   :  { %161 = vmatpush3.msra.mxu0 %v40_v8  ;;  %p177_p0 = scmp.ne.s32.totalorder %s136_s1, %s176_s7  ;;  %p182_p2 = scmp.lt.s32.totalorder %s176_s7, %s176_s7 }
   0x9   :  { %162 = vmatprep.subr.mxu0 %v198_v1  ;;  %v29_v16 = vadd.f32 %v28_v13, %v27_v11  ;;  %v23_v17 = vrot.slane %v22_v14, 2 }
   0xa   :  { %163 = vmatpush3.msra.mxu0 %v39_v12  ;;  %p183_p3 = por %p182_p2, %p181_p1 }
   0xb   :  { %164 = vmatprep.subr.mxu0 %v198_v1  ;;  %v30_v19 = vrot.slane %v29_v16, 2  ;;  %v24_v20 = vadd.f32 %v23_v17, %v22_v14 }
   0xc   :  { %165 = vmatpush3.msra.mxu0 %v38_v15  ;;  %p184_p4 = pnand %p183_p3, %p177_p0 }
   0xd   :  { %166 = vmatprep.subr.mxu0 %v198_v1  ;;  %v31_v22 = vadd.f32 %v30_v19, %v29_v16  ;;  %v25_v23 = vrot.slane %v24_v20, 1 }
   0xe   :  { %167 = vmatpush3.msra.mxu0 %v37_v18 }
   0xf   :  { %168 = vmatprep.subr.mxu0 %v198_v1  ;;  %v32_v24 = vrot.slane %v31_v22, 1  ;;  %v26_v25 = vadd.f32 %v25_v23, %v24_v20 }
  0x10   :  { %169 = vmatpush3.msra.mxu0 %v36_v21 }
  0x11   :  { %v33_v26 = vadd.f32 %v32_v24, %v31_v22  ;;  %v34_v27 = vmul.f32 0.25, %v26_v25 }
  0x13   :  { %v35_v28 = vmul.f32 0.25, %v33_v26 }
  0x15   :  { %v54_v29 = vsel %vm53_vm2, %v35_v28, %v34_v27 }
  0x16   :  { %171 = vmatmul.mubr.msk.f32.vlgmr.msra.gmra.mxu0 %vm55_vm3, %v54_v29 }
  0xd6   :  { %v124_v31 = vpop.f32.mrf.mxu0 }
  0xd7   :  { %v125_v32 = vadd.f32 %v143_v30, %v124_v31 }
  0xd8   :  { %v172_v33 = vpop.f32.mrf.mxu0 }
  0xd9   :  { %128 = vst [vmem:[#allocation2] sm:$0x3] %v125_v32 }
  0xda   :  { %187 = shalt.err (!%p184_p4)
}
  0xdb   :  { %138 = dma.vmem_to_hbm [thread:$0]  %s136_s1, 32, %s260_s3, [#allocation3]  }
  0xdc   :  { %196 = dma.done.wait [#allocation3], 32  }
  0xdd   :  { %197 = vsyncadd [#allocation3], 4294967264 }
  0xde   :  { %142 = vsyncpa [#allocation3], 1 }

</bundles_post_ra>
